<compile_context>
chip_gen: v6e
topology: v6e:2x2x1
jax: 0.10.0
libtpu: 0.0.40
codegen_flags: <defaults>
</compile_context>

<pallas_src>
import jax
import jax.numpy as jnp
import numpy as np
from jax.experimental import pallas as pl
from jax.experimental.pallas import tpu as pltpu

H1, H2, DOUT = 1024, 512, 2
DOUT_PAD = 128          # lane-dense padded output width
EPS = 1e-5
TM_MAX = 512            # max batch tile (review: raise from 128; 256-1024 range)
TK_MAX = 512            # max fc1 reduction tile (bounds W1 VMEM residency)


def _round_up(x, m):
    return (x + m - 1) // m * m


# ------------------------------ fused kernel --------------------------------

def _fused_mlp_kernel(alpha_ref, x_ref, w1_ref, t1_ref, w2_ref, t2_ref,
                      w3_ref, t3_ref, o_ref, acc_ref):
    """One (batch-tile i, fc1-K-tile k) grid step of the fused 3-layer MLP.

    alpha_ref : SMEM (2,) f32         PReLU scalars
    x_ref     : (tm, tk)   f32        input tile (cast to bf16 in-kernel)
    w1_ref    : (tk, H1)   bf16       fc1 weight * bn1 scale (K tile)
    t1_ref    : (1, H1)    f32        folded bn1 shift (includes fc1 bias)
    w2_ref    : (H1, H2)   bf16       fc2 weight * bn2 scale (resident)
    t2_ref    : (1, H2)    f32        folded bn2 shift
    w3_ref    : (H2, 128)  bf16       fc3 weight * bn3 scale (2 -> 128 padded)
    t3_ref    : (1, 128)   f32        folded bn3 shift (pad columns are zero)
    o_ref     : (tm, 128)  bf16       output tile
    acc_ref   : (tm, H1)   f32 VMEM   fc1 accumulator across K tiles
    """
    k = pl.program_id(1)

    @pl.when(k == 0)
    def _():
        acc_ref[...] = jnp.zeros_like(acc_ref)

    # fc1 partial product (bf16 MXU, f32 accumulation).
    acc_ref[...] += jnp.dot(x_ref[...].astype(jnp.bfloat16), w1_ref[...],
                            preferred_element_type=jnp.float32)

    @pl.when(k == pl.num_programs(1) - 1)
    def _():
        a1 = alpha_ref[0]
        a2 = alpha_ref[1]

        # bn1 shift + PReLU1 (bn1 scale already folded into W1 columns).
        h = acc_ref[...] + t1_ref[...]
        h = jnp.where(h >= 0.0, h, a1 * h)

        # fc2 + bn2 shift + PReLU2.
        h = jnp.dot(h.astype(jnp.bfloat16), w2_ref[...],
                    preferred_element_type=jnp.float32)
        h = h + t2_ref[...]
        h = jnp.where(h >= 0.0, h, a2 * h)

        # fc3 + bn3 shift (output padded to 128 lanes; pad columns are zero).
        h = jnp.dot(h.astype(jnp.bfloat16), w3_ref[...],
                    preferred_element_type=jnp.float32)
        o_ref[...] = (h + t3_ref[...]).astype(o_ref.dtype)


# --------------------------- parameter preparation --------------------------

def init_params(key, inputsize):
    ks = jax.random.split(key, 18)

    def nrm(k, shape, s=1.0):
        return s * jax.random.normal(k, shape, jnp.float32)

    p = {
        # Linear weights stored as (in, out)  (PyTorch stores (out, in); transposed)
        "w1": nrm(ks[0], (inputsize, H1), float(inputsize) ** -0.5),
        "b1": nrm(ks[1], (H1,), 0.01),
        "w2": nrm(ks[2], (H1, H2), float(H1) ** -0.5),
        "b2": nrm(ks[3], (H2,), 0.01),
        "w3": nrm(ks[4], (H2, DOUT), float(H2) ** -0.5),
        "b3": nrm(ks[5], (DOUT,), 0.01),
        "prelu1": jnp.float32(0.25),
        "prelu2": jnp.float32(0.25),
    }
    for i, d, k0 in ((1, H1, 6), (2, H2, 10), (3, DOUT, 14)):
        p[f"bn{i}_gamma"] = 1.0 + 0.1 * nrm(ks[k0], (d,))
        p[f"bn{i}_beta"] = 0.05 * nrm(ks[k0 + 1], (d,))
        p[f"bn{i}_mean"] = 0.05 * nrm(ks[k0 + 2], (d,))
        p[f"bn{i}_var"] = jnp.abs(1.0 + 0.1 * nrm(ks[k0 + 3], (d,)))
    return p


def _fold_layer(w, b, gamma, beta, mean, var, in_pad, out_pad):
    """bn(x @ w + b) = x @ (w*scale) + shift   (inference-mode BN).

    The scale is folded into the bf16 weight columns; only the f32 shift is
    applied in the kernel.
    """
    scale = gamma / jnp.sqrt(var + EPS)
    shift = (b - mean) * scale + beta
    w = w * scale[None, :]
    din, dout = w.shape
    if in_pad > din:
        w = jnp.pad(w, ((0, in_pad - din), (0, 0)))
    if out_pad > dout:
        w = jnp.pad(w, ((0, 0), (0, out_pad - dout)))
        shift = jnp.pad(shift, (0, out_pad - dout))
    return w.astype(jnp.bfloat16), shift[None, :].astype(jnp.float32)


def prepare_params(params, inputsize):
    din_p = _round_up(inputsize, 128)
    w1, t1 = _fold_layer(params["w1"], params["b1"], params["bn1_gamma"],
                         params["bn1_beta"], params["bn1_mean"],
                         params["bn1_var"], din_p, H1)
    w2, t2 = _fold_layer(params["w2"], params["b2"], params["bn2_gamma"],
                         params["bn2_beta"], params["bn2_mean"],
                         params["bn2_var"], H1, H2)
    w3, t3 = _fold_layer(params["w3"], params["b3"], params["bn3_gamma"],
                         params["bn3_beta"], params["bn3_mean"],
                         params["bn3_var"], H2, DOUT_PAD)
    alphas = jnp.stack([params["prelu1"], params["prelu2"]]).astype(jnp.float32)
    return dict(w1=w1, t1=t1, w2=w2, t2=t2, w3=w3, t3=t3,
                alphas=alphas, din_p=din_p)


# ------------------------------ tiling helpers -------------------------------

def _pick_batch_tile(b):
    if b <= 8:
        return b                                   # single tile == full array dim
    if b <= 2 * TM_MAX:
        # Two roughly even tiles -> >= 2 "parallel" grid steps (v7x megacore).
        return _round_up((b + 1) // 2, 8)
    return TM_MAX


def _pick_k_tile(din_p):
    if din_p <= TK_MAX:
        return din_p
    for d in (512, 384, 256, 128):                 # din_p is a multiple of 128
        if din_p % d == 0:
            return d
    return 128


def _vmem_limit_bytes(tm, tk):
    blocks = (2 * tm * tk * 4                      # x tiles (f32, double buffered)
              + 2 * tk * H1 * 2                    # W1 K-tiles (bf16, double buffered)
              + 2 * H1 * H2 * 2                    # W2 (resident; 2 bufs allocated)
              + 2 * H2 * DOUT_PAD * 2              # W3
              + 2 * (H1 + H2 + DOUT_PAD) * 4       # bn shifts
              + 2 * tm * DOUT_PAD * 2              # output tiles (bf16)
              + tm * H1 * 4)                       # f32 accumulator scratch
    headroom = 3 * tm * H1 * 4 + (8 << 20)         # f32 epilogue temps + internal
    return int(min(max(blocks + headroom, 24 << 20), 48 << 20))


# ------------------------------ forward wrapper ------------------------------

def baseline_model2_forward(prep, x):
    """Mirrors BaselineModel2.forward (returns the (B, 2) bn3 output, f32)."""
    b, din = x.shape
    din_p = prep["din_p"]
    x = x.astype(jnp.float32)
    if din_p > din:                                # only if inputsize % 128 != 0
        x = jnp.pad(x, ((0, 0), (0, din_p - din)))

    tm = _pick_batch_tile(b)
    tk = _pick_k_tile(din_p)
    nm = pl.cdiv(b, tm)
    nk = din_p // tk

    flops = 2 * b * (din_p * H1 + H1 * H2 + H2 * DOUT_PAD)
    bytes_accessed = (b * din_p * 4 + b * DOUT_PAD * 2
                      + (din_p * H1 + H1 * H2 + H2 * DOUT_PAD) * 2
                      + (H1 + H2 + DOUT_PAD) * 4)

    out_p = pl.pallas_call(
        _fused_mlp_kernel,
        out_shape=jax.ShapeDtypeStruct((b, DOUT_PAD), jnp.bfloat16),
        grid_spec=pltpu.PrefetchScalarGridSpec(
            num_scalar_prefetch=0,
            grid=(nm, nk),                                          # reduction last
            in_specs=[
                pl.BlockSpec(memory_space=pltpu.MemorySpace.SMEM),  # PReLU alphas
                pl.BlockSpec((tm, tk), lambda i, k: (i, k)),        # x tile (f32)
                pl.BlockSpec((tk, H1), lambda i, k: (k, 0)),        # W1 K-tile
                pl.BlockSpec((1, H1), lambda i, k: (0, 0)),         # bn1 shift
                pl.BlockSpec((H1, H2), lambda i, k: (0, 0)),        # W2 (resident)
                pl.BlockSpec((1, H2), lambda i, k: (0, 0)),         # bn2 shift
                pl.BlockSpec((H2, DOUT_PAD), lambda i, k: (0, 0)),  # W3 (padded)
                pl.BlockSpec((1, DOUT_PAD), lambda i, k: (0, 0)),   # bn3 shift
            ],
            out_specs=pl.BlockSpec((tm, DOUT_PAD), lambda i, k: (i, 0)),
            scratch_shapes=[pltpu.VMEM((tm, H1), jnp.float32)],     # fc1 accumulator
        ),
        compiler_params=pltpu.CompilerParams(
            dimension_semantics=("parallel", "arbitrary"),
            vmem_limit_bytes=_vmem_limit_bytes(tm, tk)),
        cost_estimate=pl.CostEstimate(flops=flops, transcendentals=0,
                                      bytes_accessed=bytes_accessed),
    )(prep["alphas"], x, prep["w1"], prep["t1"], prep["w2"], prep["t2"],
      prep["w3"], prep["t3"])

    return out_p[:, :DOUT].astype(jnp.float32)


# ------------------------------- references ----------------------------------

def _reference_forward(prep, x):
    """Pure-JAX reference with identical numerics (bf16 matmuls, folded BN)."""
    b, din = x.shape
    din_p = prep["din_p"]
    x = x.astype(jnp.float32)
    if din_p > din:
        x = jnp.pad(x, ((0, 0), (0, din_p - din)))
    a1, a2 = prep["alphas"][0], prep["alphas"][1]
    h = jnp.dot(x.astype(jnp.bfloat16), prep["w1"], preferred_element_type=jnp.float32)
    h = h + prep["t1"]
    h = jnp.where(h >= 0.0, h, a1 * h)
    h = jnp.dot(h.astype(jnp.bfloat16), prep["w2"], preferred_element_type=jnp.float32)
    h = h + prep["t2"]
    h = jnp.where(h >= 0.0, h, a2 * h)
    h = jnp.dot(h.astype(jnp.bfloat16), prep["w3"], preferred_element_type=jnp.float32)
    h = (h + prep["t3"]).astype(jnp.bfloat16)
    return h[:, :DOUT].astype(jnp.float32)


def _reference_forward_f32(params, x):
    """Full-precision reference straight from the raw (unfolded) parameters."""
    def bn(h, g, bt, mean, var):
        return (h - mean) * (g / jnp.sqrt(var + EPS)) + bt

    h = x @ params["w1"] + params["b1"]
    h = bn(h, params["bn1_gamma"], params["bn1_beta"], params["bn1_mean"], params["bn1_var"])
    h = jnp.where(h >= 0.0, h, params["prelu1"] * h)
    h = h @ params["w2"] + params["b2"]
    h = bn(h, params["bn2_gamma"], params["bn2_beta"], params["bn2_mean"], params["bn2_var"])
    h = jnp.where(h >= 0.0, h, params["prelu2"] * h)
    h = h @ params["w3"] + params["b3"]
    h = bn(h, params["bn3_gamma"], params["bn3_beta"], params["bn3_mean"], params["bn3_var"])
    return h


if __name__ == "__main__":
    key = jax.random.PRNGKey(0)
    k1, k2, k3, k4 = jax.random.split(key, 4)

    # --- Test 1: small shapes (single batch tile, single K tile) -------------
    B1, IN1 = 8, 128
    x1 = jax.random.normal(k1, (B1, IN1), jnp.float32)
    params1 = init_params(k2, IN1)
    prep1 = prepare_params(params1, IN1)

    out1 = jax.block_until_ready(baseline_model2_forward(prep1, x1))
    assert out1.shape == (B1, DOUT), out1.shape
    assert bool(jnp.all(jnp.isfinite(out1)))
    ref1 = _reference_forward(prep1, x1)
    np.testing.assert_allclose(np.asarray(out1), np.asarray(ref1), rtol=2e-2, atol=2e-2)
    ref1_f32 = _reference_forward_f32(params1, x1)
    np.testing.assert_allclose(np.asarray(out1), np.asarray(ref1_f32), rtol=1e-1, atol=1e-1)

    # --- Test 2: multi batch-tile + multi K-tile + ragged batch edge ----------
    B2, IN2 = 20, 1024
    x2 = jax.random.normal(k3, (B2, IN2), jnp.float32)
    params2 = init_params(k4, IN2)
    prep2 = prepare_params(params2, IN2)

    out2 = jax.block_until_ready(baseline_model2_forward(prep2, x2))
    assert out2.shape == (B2, DOUT), out2.shape
    assert bool(jnp.all(jnp.isfinite(out2)))
    ref2 = _reference_forward(prep2, x2)
    np.testing.assert_allclose(np.asarray(out2), np.asarray(ref2), rtol=2e-2, atol=2e-2)

    print("KERNEL_OK")
</pallas_src>

<mosaic_0001>
module attributes {stable_mosaic.version = 11 : i64} {
  func.func @_fused_mlp_kernel(%arg0: i32, %arg1: i32, %arg2: memref<2xf32, #tpu.memory_space<smem>>, %arg3: memref<8x128xf32, #tpu.memory_space<vmem>>, %arg4: memref<128x1024xbf16, #tpu.memory_space<vmem>>, %arg5: memref<1x1024xf32, #tpu.memory_space<vmem>>, %arg6: memref<1024x512xbf16, #tpu.memory_space<vmem>>, %arg7: memref<1x512xf32, #tpu.memory_space<vmem>>, %arg8: memref<512x128xbf16, #tpu.memory_space<vmem>>, %arg9: memref<1x128xf32, #tpu.memory_space<vmem>>, %arg10: memref<8x128xbf16, #tpu.memory_space<vmem>>, %arg11: memref<8x1024xf32, #tpu.memory_space<vmem>>) attributes {dimension_semantics = [#tpu.dimension_semantics<parallel>, #tpu.dimension_semantics<arbitrary>], iteration_bounds = array<i64: 1, 1>, scalar_prefetch = 0 : i64, scratch_operands = 1 : i64, tpu.core_type = #tpu.core_type<tc>, window_params = [{transform_indices = @transform_0, window_bounds = array<i64: 2>}, {transform_indices = @transform_1, window_bounds = array<i64: 8, 128>}, {transform_indices = @transform_2, window_bounds = array<i64: 128, 1024>}, {pipeline_mode = #tpu.pipeline_mode<synchronous>, transform_indices = @transform_3, window_bounds = array<i64: 1, 1024>}, {pipeline_mode = #tpu.pipeline_mode<synchronous>, transform_indices = @transform_4, window_bounds = array<i64: 1024, 512>}, {pipeline_mode = #tpu.pipeline_mode<synchronous>, transform_indices = @transform_5, window_bounds = array<i64: 1, 512>}, {pipeline_mode = #tpu.pipeline_mode<synchronous>, transform_indices = @transform_6, window_bounds = array<i64: 512, 128>}, {pipeline_mode = #tpu.pipeline_mode<synchronous>, transform_indices = @transform_7, window_bounds = array<i64: 1, 128>}, {transform_indices = @transform_8, window_bounds = array<i64: 8, 128>}]} {
    %c0_i32 = arith.constant 0 : i32
    %0 = arith.cmpi eq, %arg1, %c0_i32 : i32
    %1 = arith.extui %0 : i1 to i32
    %c0_i32_0 = arith.constant 0 : i32
    %2 = arith.cmpi ne, %1, %c0_i32_0 : i32
    scf.if %2 {
      %cst_10 = arith.constant 0.000000e+00 : f32
      %13 = vector.broadcast %cst_10 : f32 to vector<8x1024xf32>
      %c0_11 = arith.constant 0 : index
      %c0_12 = arith.constant 0 : index
      %14 = vector.load %arg11[%c0_11, %c0_12] : memref<8x1024xf32, #tpu.memory_space<vmem>>, vector<8x1024xf32>
      tpu.vector_store %arg11[%c0_11, %c0_12], %13 {strides = array<i32>} : memref<8x1024xf32, #tpu.memory_space<vmem>>, vector<8x1024xf32>,
    } else {
    }
    %c0 = arith.constant 0 : index
    %c0_1 = arith.constant 0 : index
    %3 = vector.load %arg11[%c0, %c0_1] : memref<8x1024xf32, #tpu.memory_space<vmem>>, vector<8x1024xf32>
    %c0_2 = arith.constant 0 : index
    %c0_3 = arith.constant 0 : index
    %4 = vector.load %arg3[%c0_2, %c0_3] : memref<8x128xf32, #tpu.memory_space<vmem>>, vector<8x128xf32>
    %5 = arith.truncf %4 : vector<8x128xf32> to vector<8x128xbf16>
    %c0_4 = arith.constant 0 : index
    %c0_5 = arith.constant 0 : index
    %6 = vector.load %arg4[%c0_4, %c0_5] : memref<128x1024xbf16, #tpu.memory_space<vmem>>, vector<128x1024xbf16>
    %cst = arith.constant dense<0.000000e+00> : vector<8x1024xf32>
    %7 = tpu.matmul %5, %6, %cst {dimension_numbers = #tpu.dot_dimension_numbers<[1], [0], [0], [1], [0, 0, 1, 1], [], []>} : vector<8x128xbf16>, vector<128x1024xbf16>, vector<8x1024xf32> -> vector<8x1024xf32>
    %8 = arith.addf %3, %7 : vector<8x1024xf32>
    %c0_6 = arith.constant 0 : index
    %c0_7 = arith.constant 0 : index
    %9 = vector.load %arg11[%c0_6, %c0_7] : memref<8x1024xf32, #tpu.memory_space<vmem>>, vector<8x1024xf32>
    tpu.vector_store %arg11[%c0_6, %c0_7], %8 {strides = array<i32>} : memref<8x1024xf32, #tpu.memory_space<vmem>>, vector<8x1024xf32>,
    %c0_i32_8 = arith.constant 0 : i32
    %10 = arith.cmpi eq, %arg1, %c0_i32_8 : i32
    %11 = arith.extui %10 : i1 to i32
    %c0_i32_9 = arith.constant 0 : i32
    %12 = arith.cmpi ne, %11, %c0_i32_9 : i32
    scf.if %12 {
      %c0_10 = arith.constant 0 : index
      %13 = memref.load %arg2[%c0_10] : memref<2xf32, #tpu.memory_space<smem>>
      %c1 = arith.constant 1 : index
      %14 = memref.load %arg2[%c1] : memref<2xf32, #tpu.memory_space<smem>>
      %c0_11 = arith.constant 0 : index
      %c0_12 = arith.constant 0 : index
      %15 = vector.load %arg11[%c0_11, %c0_12] : memref<8x1024xf32, #tpu.memory_space<vmem>>, vector<8x1024xf32>
      %c0_13 = arith.constant 0 : index
      %c0_14 = arith.constant 0 : index
      %16 = vector.load %arg5[%c0_13, %c0_14] : memref<1x1024xf32, #tpu.memory_space<vmem>>, vector<1x1024xf32>
      %17 = vector.broadcast %16 : vector<1x1024xf32> to vector<8x1024xf32>
      %18 = arith.addf %15, %17 : vector<8x1024xf32>
      %cst_15 = arith.constant 0.000000e+00 : f32
      %19 = vector.broadcast %cst_15 : f32 to vector<8x1024xf32>
      %20 = arith.cmpf oge, %18, %19 : vector<8x1024xf32>
      %21 = vector.broadcast %13 : f32 to vector<8x1024xf32>
      %22 = arith.mulf %21, %18 : vector<8x1024xf32>
      %23 = arith.select %20, %18, %22 : vector<8x1024xi1>, vector<8x1024xf32>
      %24 = arith.truncf %23 : vector<8x1024xf32> to vector<8x1024xbf16>
      %c0_16 = arith.constant 0 : index
      %c0_17 = arith.constant 0 : index
      %25 = vector.load %arg6[%c0_16, %c0_17] : memref<1024x512xbf16, #tpu.memory_space<vmem>>, vector<1024x512xbf16>
      %cst_18 = arith.constant dense<0.000000e+00> : vector<8x512xf32>
      %26 = tpu.matmul %24, %25, %cst_18 {dimension_numbers = #tpu.dot_dimension_numbers<[1], [0], [0], [1], [0, 0, 1, 1], [], []>} : vector<8x1024xbf16>, vector<1024x512xbf16>, vector<8x512xf32> -> vector<8x512xf32>
      %c0_19 = arith.constant 0 : index
      %c0_20 = arith.constant 0 : index
      %27 = vector.load %arg7[%c0_19, %c0_20] : memref<1x512xf32, #tpu.memory_space<vmem>>, vector<1x512xf32>
      %28 = vector.broadcast %27 : vector<1x512xf32> to vector<8x512xf32>
      %29 = arith.addf %26, %28 : vector<8x512xf32>
      %cst_21 = arith.constant 0.000000e+00 : f32
      %30 = vector.broadcast %cst_21 : f32 to vector<8x512xf32>
      %31 = arith.cmpf oge, %29, %30 : vector<8x512xf32>
      %32 = vector.broadcast %14 : f32 to vector<8x512xf32>
      %33 = arith.mulf %32, %29 : vector<8x512xf32>
      %34 = arith.select %31, %29, %33 : vector<8x512xi1>, vector<8x512xf32>
      %35 = arith.truncf %34 : vector<8x512xf32> to vector<8x512xbf16>
      %c0_22 = arith.constant 0 : index
      %c0_23 = arith.constant 0 : index
      %36 = vector.load %arg8[%c0_22, %c0_23] : memref<512x128xbf16, #tpu.memory_space<vmem>>, vector<512x128xbf16>
      %cst_24 = arith.constant dense<0.000000e+00> : vector<8x128xf32>
      %37 = tpu.matmul %35, %36, %cst_24 {dimension_numbers = #tpu.dot_dimension_numbers<[1], [0], [0], [1], [0, 0, 1, 1], [], []>} : vector<8x512xbf16>, vector<512x128xbf16>, vector<8x128xf32> -> vector<8x128xf32>
      %c0_25 = arith.constant 0 : index
      %c0_26 = arith.constant 0 : index
      %38 = vector.load %arg9[%c0_25, %c0_26] : memref<1x128xf32, #tpu.memory_space<vmem>>, vector<1x128xf32>
      %39 = vector.broadcast %38 : vector<1x128xf32> to vector<8x128xf32>
      %40 = arith.addf %37, %39 : vector<8x128xf32>
      %41 = arith.truncf %40 : vector<8x128xf32> to vector<8x128xbf16>
      %c0_27 = arith.constant 0 : index
      %c0_28 = arith.constant 0 : index
      %42 = vector.load %arg10[%c0_27, %c0_28] : memref<8x128xbf16, #tpu.memory_space<vmem>>, vector<8x128xbf16>
      tpu.vector_store %arg10[%c0_27, %c0_28], %41 {strides = array<i32>} : memref<8x128xbf16, #tpu.memory_space<vmem>>, vector<8x128xbf16>,
    } else {
    }
    return
  }
  func.func @transform_0(%arg0: i32, %arg1: i32) -> i32 {
    %c0_i32 = arith.constant 0 : i32
    %c0_i32_0 = arith.constant 0 : i32
    return %c0_i32 : i32
  }
  func.func @transform_1(%arg0: i32, %arg1: i32) -> (i32, i32) {
    %c0_i32 = arith.constant 0 : i32
    return %arg0, %arg1 : i32, i32
  }
  func.func @transform_2(%arg0: i32, %arg1: i32) -> (i32, i32) {
    %c0_i32 = arith.constant 0 : i32
    %c0_i32_0 = arith.constant 0 : i32
    return %arg1, %c0_i32 : i32, i32
  }
  func.func @transform_3(%arg0: i32, %arg1: i32) -> (i32, i32) {
    %c0_i32 = arith.constant 0 : i32
    %c0_i32_0 = arith.constant 0 : i32
    %c0_i32_1 = arith.constant 0 : i32
    return %c0_i32, %c0_i32_0 : i32, i32
  }
  func.func @transform_4(%arg0: i32, %arg1: i32) -> (i32, i32) {
    %c0_i32 = arith.constant 0 : i32
    %c0_i32_0 = arith.constant 0 : i32
    %c0_i32_1 = arith.constant 0 : i32
    return %c0_i32, %c0_i32_0 : i32, i32
  }
  func.func @transform_5(%arg0: i32, %arg1: i32) -> (i32, i32) {
    %c0_i32 = arith.constant 0 : i32
    %c0_i32_0 = arith.constant 0 : i32
    %c0_i32_1 = arith.constant 0 : i32
    return %c0_i32, %c0_i32_0 : i32, i32
  }
  func.func @transform_6(%arg0: i32, %arg1: i32) -> (i32, i32) {
    %c0_i32 = arith.constant 0 : i32
    %c0_i32_0 = arith.constant 0 : i32
    %c0_i32_1 = arith.constant 0 : i32
    return %c0_i32, %c0_i32_0 : i32, i32
  }
  func.func @transform_7(%arg0: i32, %arg1: i32) -> (i32, i32) {
    %c0_i32 = arith.constant 0 : i32
    %c0_i32_0 = arith.constant 0 : i32
    %c0_i32_1 = arith.constant 0 : i32
    return %c0_i32, %c0_i32_0 : i32, i32
  }
  func.func @transform_8(%arg0: i32, %arg1: i32) -> (i32, i32) {
    %c0_i32 = arith.constant 0 : i32
    %c0_i32_0 = arith.constant 0 : i32
    return %arg0, %c0_i32 : i32, i32
  }
}

</mosaic_0001>

<bundles_post_ra>
// kernel: tpu_custom_call.1
= control target key start
LH: loop header
LB: loop body
LE: loop exit
PB: predicated region body
PF: predicated region fallthrough
CT: control target
= control target key end

     0   :  { %13 = vsyncpa [#allocation6], 0  ;;  %s4208_s0 = inlined_call_operand.hbm [shape: f32[2], index: 0, kind: input, shape index: {}]   ;;  %s4209_s1 = inlined_call_operand.hbm [shape: f32[8,128], index: 1, kind: input, shape index: {}]   ;;  %s4210_s2 = inlined_call_operand.hbm [shape: bf16[128,1024], index: 2, kind: input, shape index: {}]   ;;  %s4211_s3 = inlined_call_operand.hbm [shape: f32[1,1024], index: 3, kind: input, shape index: {}]   ;;  %s4212_s4 = inlined_call_operand.hbm [shape: bf16[1024,512], index: 4, kind: input, shape index: {}]   ;;  %s4213_s5 = inlined_call_operand.vmem [shape: f32[1,512], index: 5, kind: input, shape index: {}]   ;;  %s4214_s6 = inlined_call_operand.hbm [shape: bf16[512,128], index: 6, kind: input, shape index: {}]   ;;  %s4215_s7 = inlined_call_operand.vmem [shape: f32[1,128], index: 7, kind: input, shape index: {}]   ;;  %s4216_s8 = inlined_call_operand.hbm [shape: bf16[8,128], index: 8, kind: output, shape index: {}]  }
   0x1   :  { %14 = vsyncpa [#allocation4], 0 }
   0x2   :  { %15 = vsyncpa [#allocation9], 0 }
   0x3   :  { %16 = vsyncpa [#allocation12], 0 }
   0x4   :  { %17 = vsyncpa [#allocation5], 0  ;;  %s4020_s27 = smov [#allocation8]  }
   0x5   :  { %s41_s28 = sshll.u32 %s4020_s27, 4  ;;  %s42_s28 = int_to_ptr.vmem [resolvable:$true] %s41_s28 }
   0x6   :  { %s3890_s29 = scalar_lea.vmem %s42_s28, 8192  ;;  %p3895_p1 = scmp.lt.s32.totalorder %s42_s28, %s42_s28 }
   0x7   :  { %p3891_p0 = scmp.ne.s32.totalorder %s42_s28, %s3890_s29  ;;  %p3896_p2 = scmp.lt.s32.totalorder %s3890_s29, %s3890_s29 }
   0x9   :  { %p3897_p3 = por %p3896_p2, %p3895_p1 }
   0xb   :  { %p3898_p4 = pnand %p3897_p3, %p3891_p0 }
   0xd   :  { %3901 = shalt.err (!%p3898_p4)
}
   0xe   :  { %s4021_s30 = smov 512   ;;  %s4022_s9 = smov 32  }
   0xf   :  { %47 = dma.hbm_to_vmem [thread:$0]  %s4210_s2, 8192, %s42_s28, [#allocation9], %s4021_s30, %s4021_s30, %s4022_s9  }
  0x10   :  { %s4023_s12 = smov [#allocation11]  }
  0x11   :  { %s63_s13 = sshll.u32 %s4023_s12, 4  ;;  %s64_s13 = int_to_ptr.vmem [resolvable:$true] %s63_s13 }
  0x12   :  { %s3910_s14 = scalar_lea.vmem %s64_s13, 32768  ;;  %p3915_p6 = scmp.lt.s32.totalorder %s64_s13, %s64_s13 }
  0x13   :  { %p3911_p5 = scmp.ne.s32.totalorder %s64_s13, %s3910_s14  ;;  %p3916_p7 = scmp.lt.s32.totalorder %s3910_s14, %s3910_s14 }
  0x15   :  { %p3917_p8 = por %p3916_p7, %p3915_p6 }
  0x17   :  { %p3918_p9 = pnand %p3917_p8, %p3911_p5 }
  0x19   :  { %3921 = shalt.err (!%p3918_p9)
}
  0x1a   :  { %s4024_s15 = smov 256   ;;  %s4025_s16 = smov 16  }
  0x1b   :  { %69 = dma.hbm_to_vmem [thread:$0]  %s4212_s4, 32768, %s64_s13, [#allocation12], %s4024_s15, %s4024_s15, %s4025_s16  }
  0x1c   :  { %s4026_s19 = smov [#allocation3]   ;;  %s4027_s2 = smov [#allocation7]  }
  0x1d   :  { %25 = dma.hbm_to_smem %s4208_s0, 16, %s4026_s19, [#allocation6]  }
  0x1e   :  { %s32_s22 = sshll.u32 %s4027_s2, 4  ;;  %s4028_s23 = smov [#allocation10]   ;;  %s33_s22 = int_to_ptr.vmem [resolvable:$true] %s32_s22 }
  0x1f   :  { %s54_s24 = sshll.u32 %s4028_s23, 4  ;;  %s3938_s25 = scalar_lea.vmem %s33_s22, 128  ;;  %s55_s24 = int_to_ptr.vmem [resolvable:$true] %s54_s24 }
  0x20   :  { %p3939_p10 = scmp.ne.s32.totalorder %s33_s22, %s3938_s25  ;;  %p3943_p11 = scmp.lt.s32.totalorder %s33_s22, %s33_s22 }
  0x21   :  { %p3944_p12 = scmp.lt.s32.totalorder %s3938_s25, %s3938_s25 }
  0x23   :  { %p3945_p13 = por %p3944_p12, %p3943_p11 }
  0x25   :  { %p3946_p0 = pnand %p3945_p13, %p3939_p10 }
  0x27   :  { %3949 = shalt.err (!%p3946_p0)
}
  0x28   :  { %35 = dma.hbm_to_vmem [thread:$0]  %s4209_s1, 128, %s33_s22, [#allocation4]  }
  0x29   :  { %s3958_s4 = scalar_lea.vmem %s55_s24, 128  ;;  %p3963_p2 = scmp.lt.s32.totalorder %s55_s24, %s55_s24 }
  0x2a   :  { %p3959_p1 = scmp.ne.s32.totalorder %s55_s24, %s3958_s4  ;;  %p3964_p3 = scmp.lt.s32.totalorder %s3958_s4, %s3958_s4 }
  0x2c   :  { %p3965_p4 = por %p3964_p3, %p3963_p2 }
  0x2e   :  { %p3966_p5 = pnand %p3965_p4, %p3959_p1 }
  0x30   :  { %3969 = shalt.err (!%p3966_p5)
}
  0x31   :  { %57 = dma.hbm_to_vmem [thread:$0]  %s4211_s3, 128, %s55_s24, [#allocation9]  }
  0x32   :  { %s4029_s29 = smov [#allocation13]  }
  0x33   :  { %s77_s30 = sshll.u32 %s4029_s29, 4  ;;  %s78_s30 = int_to_ptr.vmem [resolvable:$true] %s77_s30 }
  0x34   :  { %s3978_s9 = scalar_lea.vmem %s78_s30, 4096  ;;  %p3983_p7 = scmp.lt.s32.totalorder %s78_s30, %s78_s30 }
  0x35   :  { %p3979_p6 = scmp.ne.s32.totalorder %s78_s30, %s3978_s9  ;;  %p3984_p8 = scmp.lt.s32.totalorder %s3978_s9, %s3978_s9 }
  0x37   :  { %p3985_p9 = por %p3984_p8, %p3983_p7 }
  0x39   :  { %p3986_p10 = pnand %p3985_p9, %p3979_p6 }
  0x3b   :  { %3989 = shalt.err (!%p3986_p10)
}
  0x3c   :  { %s4030_s1 = smov 64   ;;  %s4031_s10 = smov 4  }
  0x3d   :  { %83 = dma.hbm_to_vmem [thread:$0]  %s4214_s6, 4096, %s78_s30, [#allocation12], %s4030_s1, %s4030_s1, %s4031_s10  }
  0x3e   :  { %4010 = dma.done.wait [#allocation6], 16  }
  0x3f   :  { %4011 = vsyncadd [#allocation6], 4294967280 }
  0x40   :  { %4012 = dma.done.wait [#allocation4], 128  }
  0x41   :  { %4013 = vsyncadd [#allocation4], 4294967168 }
  0x42   :  { %4014 = dma.done.wait [#allocation9], 8320  }
  0x43   :  { %4015 = vsyncadd [#allocation9], 4294958976 }
  0x44   :  { %4016 = dma.done.wait [#allocation12], 36864  }
  0x45   :  { %4017 = vsyncadd [#allocation12], 4294930432 }
  0x46   :  { %104 = sfence }
  0x47   :  { %v184_v0 = vld [vmem:[#allocation8 + $0x1c0] sm:$0xff]  ;;  %v185_v2 = vld [vmem:[#allocation8 + $0x1c8] sm:$0xff]  ;;  %v4032_v8 = vmov 0   ;;  %v186_v62 = vld [vmem:[#allocation8 + $0x1d0] sm:$0xff]  ;;  %s695_s3 = sld [smem:[#allocation3]]  ;;  %s4033_s16 = smov [#allocation14]  }
  0x48   :  { %v188_v1 = vld [vmem:[#allocation8 + $0x1e0] sm:$0xff]  ;;  %v189_v4 = vld [vmem:[#allocation8 + $0x1e8] sm:$0xff]  ;;  %544 = vmatprep.mubr.bf16.mxu0 %v4032_v8  ;;  %585 = vmatprep.mubr.bf16.mxu1 %v4032_v8  ;;  %s3118_s14 = sld [smem:[#allocation3 + $0x1]]  ;;  %s3042_s17 = sshll.u32 %s4033_s16, 4  ;;  %s3043_s17 = int_to_ptr.vmem [resolvable:$true] %s3042_s17 }
  0x49   :  { %v3111_v3 = vcombine.high %v184_v0, %v188_v1  ;;  %v3110_v5 = vcombine.low %v184_v0, %v188_v1  ;;  %v176_v6 = vld [vmem:[#allocation8 + $0x180] sm:$0xff]  ;;  %v3113_v9 = vcombine.high %v185_v2, %v189_v4  ;;  %v3112_v10 = vcombine.low %v185_v2, %v189_v4  ;;  %v177_v12 = vld [vmem:[#allocation8 + $0x188] sm:$0xff]  ;;  %v190_v0 = vld [vmem:[#allocation8 + $0x1f0] sm:$0xff]  ;;  %s3990_s18 = scalar_lea.vmem %s3043_s17, 64  ;;  %p3995_p12 = scmp.lt.s32.totalorder %s3043_s17, %s3043_s17 }
  0x4a   :  { %v180_v7 = vld [vmem:[#allocation8 + $0x1a0] sm:$0xff]  ;;  %v181_v13 = vld [vmem:[#allocation8 + $0x1a8] sm:$0xff]  ;;  %v187_v1 = vld [vmem:[#allocation8 + $0x1d8] sm:$0xff]  ;;  %p3991_p11 = scmp.ne.s32.totalorder %s3043_s17, %s3990_s18  ;;  %p3996_p13 = scmp.lt.s32.totalorder %s3990_s18, %s3990_s18 }
  0x4b   :  { %v3103_v11 = vcombine.high %v176_v6, %v180_v7  ;;  %v168_v14 = vld [vmem:[#allocation8 + $0x140] sm:$0xff]  ;;  %512 = vmatprep.subr.bf16.mxu0 %v3111_v3  ;;  %v3105_v15 = vcombine.high %v177_v12, %v181_v13  ;;  %v169_v17 = vld [vmem:[#allocation8 + $0x148] sm:$0xff]  ;;  %553 = vmatprep.subr.bf16.mxu1 %v3113_v9  ;;  %v3102_v19 = vcombine.low %v176_v6, %v180_v7  ;;  %v191_v2 = vld [vmem:[#allocation8 + $0x1f8] sm:$0xff] }
  0x4c   :  { %v172_v16 = vld [vmem:[#allocation8 + $0x160] sm:$0xff]  ;;  %v173_v18 = vld [vmem:[#allocation8 + $0x168] sm:$0xff]  ;;  %513 = vmatpush1.bf16.msra.mxu0 %v3110_v5  ;;  %554 = vmatpush1.bf16.msra.mxu1 %v3112_v10  ;;  %v3104_v20 = vcombine.low %v177_v12, %v181_v13  ;;  %v126_v4 = vld [vmem:[#allocation7] sm:$0xff]  ;;  %v3115_v6 = vcombine.high %v186_v62, %v190_v0  ;;  %v3117_v9 = vcombine.high %v187_v1, %v191_v2  ;;  %p3997_p0 = por %p3996_p13, %p3995_p12 }
  0x4d   :  { %514 = vmatprep.subr.bf16.mxu0 %v3103_v11  ;;  %v3095_v21 = vcombine.high %v168_v14, %v172_v16  ;;  %555 = vmatprep.subr.bf16.mxu1 %v3105_v15  ;;  %v3097_v22 = vcombine.high %v169_v17, %v173_v18  ;;  %v160_v23 = vld [vmem:[#allocation8 + $0x100] sm:$0xff]  ;;  %v161_v25 = vld [vmem:[#allocation8 + $0x108] sm:$0xff]  ;;  %v3094_v27 = vcombine.low %v168_v14, %v172_v16  ;;  %v178_v7 = vld [vmem:[#allocation8 + $0x190] sm:$0xff] }
  0x4e   :  { %v164_v24 = vld [vmem:[#allocation8 + $0x120] sm:$0xff]  ;;  %v165_v26 = vld [vmem:[#allocation8 + $0x128] sm:$0xff]  ;;  %v3096_v28 = vcombine.low %v169_v17, %v173_v18  ;;  %v182_v10 = vld [vmem:[#allocation8 + $0x1b0] sm:$0xff]  ;;  %v4099_v12 = vpack.c.bf16 %v126_v4, %v126_v4  ;;  %v3114_v14 = vcombine.low %v186_v62, %v190_v0  ;;  %v3116_v15 = vcombine.low %v187_v1, %v191_v2  ;;  %p3998_p1 = pnand %p3997_p0, %p3991_p11 }
  0x4f   :  { %v3087_v29 = vcombine.high %v160_v23, %v164_v24  ;;  %v3089_v30 = vcombine.high %v161_v25, %v165_v26  ;;  %v152_v31 = vld [vmem:[#allocation8 + $0xc0] sm:$0xff]  ;;  %v153_v33 = vld [vmem:[#allocation8 + $0xc8] sm:$0xff]  ;;  %v3086_v35 = vcombine.low %v160_v23, %v164_v24  ;;  %v3088_v36 = vcombine.low %v161_v25, %v165_v26  ;;  %v179_v11 = vld [vmem:[#allocation8 + $0x198] sm:$0xff] }
  0x50   :  { %515 = vmatpush1.bf16.msra.mxu0 %v3102_v19  ;;  %556 = vmatpush1.bf16.msra.mxu1 %v3104_v20  ;;  %v156_v32 = vld [vmem:[#allocation8 + $0xe0] sm:$0xff]  ;;  %v157_v34 = vld [vmem:[#allocation8 + $0xe8] sm:$0xff]  ;;  %v183_v13 = vld [vmem:[#allocation8 + $0x1b8] sm:$0xff]  ;;  %v3107_v16 = vcombine.high %v178_v7, %v182_v10 }
  0x51   :  { %516 = vmatprep.subr.bf16.mxu0 %v3095_v21  ;;  %557 = vmatprep.subr.bf16.mxu1 %v3097_v22  ;;  %v3079_v37 = vcombine.high %v152_v31, %v156_v32  ;;  %v3081_v38 = vcombine.high %v153_v33, %v157_v34  ;;  %v144_v39 = vld [vmem:[#allocation8 + $0x80] sm:$0xff]  ;;  %v145_v41 = vld [vmem:[#allocation8 + $0x88] sm:$0xff]  ;;  %v3078_v43 = vcombine.low %v152_v31, %v156_v32  ;;  %v170_v17 = vld [vmem:[#allocation8 + $0x150] sm:$0xff] }
  0x52   :  { %v148_v40 = vld [vmem:[#allocation8 + $0xa0] sm:$0xff]  ;;  %v149_v42 = vld [vmem:[#allocation8 + $0xa8] sm:$0xff]  ;;  %v3080_v44 = vcombine.low %v153_v33, %v157_v34  ;;  %v3109_v18 = vcombine.high %v179_v11, %v183_v13  ;;  %v174_v19 = vld [vmem:[#allocation8 + $0x170] sm:$0xff]  ;;  %v3106_v22 = vcombine.low %v178_v7, %v182_v10  ;;  %v3108_v23 = vcombine.low %v179_v11, %v183_v13 }
  0x53   :  { %v3071_v45 = vcombine.high %v144_v39, %v148_v40  ;;  %v3073_v46 = vcombine.high %v145_v41, %v149_v42  ;;  %v136_v47 = vld [vmem:[#allocation8 + $0x40] sm:$0xff]  ;;  %v137_v49 = vld [vmem:[#allocation8 + $0x48] sm:$0xff]  ;;  %v3070_v51 = vcombine.low %v144_v39, %v148_v40  ;;  %v3072_v52 = vcombine.low %v145_v41, %v149_v42  ;;  %v171_v20 = vld [vmem:[#allocation8 + $0x158] sm:$0xff] }
  0x54   :  { %517 = vmatpush1.bf16.msra.mxu0 %v3094_v27  ;;  %558 = vmatpush1.bf16.msra.mxu1 %v3096_v28  ;;  %v140_v48 = vld [vmem:[#allocation8 + $0x60] sm:$0xff]  ;;  %v141_v50 = vld [vmem:[#allocation8 + $0x68] sm:$0xff]  ;;  %v175_v21 = vld [vmem:[#allocation8 + $0x178] sm:$0xff]  ;;  %v3099_v24 = vcombine.high %v170_v17, %v174_v19 }
  0x55   :  { %518 = vmatprep.subr.bf16.mxu0 %v3087_v29  ;;  %559 = vmatprep.subr.bf16.mxu1 %v3089_v30  ;;  %v3063_v53 = vcombine.high %v136_v47, %v140_v48  ;;  %v128_v54 = vld [vmem:[#allocation8] sm:$0xff]  ;;  %v3065_v55 = vcombine.high %v137_v49, %v141_v50  ;;  %v129_v57 = vld [vmem:[#allocation8 + $0x8] sm:$0xff]  ;;  %v3062_v59 = vcombine.low %v136_v47, %v140_v48  ;;  %v162_v25 = vld [vmem:[#allocation8 + $0x110] sm:$0xff] }
  0x56   :  { %v132_v56 = vld [vmem:[#allocation8 + $0x20] sm:$0xff]  ;;  %v133_v58 = vld [vmem:[#allocation8 + $0x28] sm:$0xff]  ;;  %v3064_v60 = vcombine.low %v137_v49, %v141_v50  ;;  %v3101_v26 = vcombine.high %v171_v20, %v175_v21  ;;  %v166_v27 = vld [vmem:[#allocation8 + $0x130] sm:$0xff]  ;;  %v3098_v30 = vcombine.low %v170_v17, %v174_v19  ;;  %v3100_v31 = vcombine.low %v171_v20, %v175_v21 }
  0x57   :  { %v3055_v61 = vcombine.high %v128_v54, %v132_v56  ;;  %v3057_v63 = vcombine.high %v129_v57, %v133_v58  ;;  %v3054_v3 = vcombine.low %v128_v54, %v132_v56  ;;  %v3056_v5 = vcombine.low %v129_v57, %v133_v58  ;;  %v163_v28 = vld [vmem:[#allocation8 + $0x118] sm:$0xff]  ;;  %v154_v33 = vld [vmem:[#allocation8 + $0xd0] sm:$0xff] }
  0x58   :  { %519 = vmatpush1.bf16.msra.mxu0 %v3086_v35  ;;  %560 = vmatpush1.bf16.msra.mxu1 %v3088_v36  ;;  %v167_v29 = vld [vmem:[#allocation8 + $0x138] sm:$0xff]  ;;  %v3091_v32 = vcombine.high %v162_v25, %v166_v27  ;;  %v158_v35 = vld [vmem:[#allocation8 + $0xf0] sm:$0xff] }
  0x59   :  { %520 = vmatprep.subr.bf16.mxu0 %v3079_v37  ;;  %561 = vmatprep.subr.bf16.mxu1 %v3081_v38  ;;  %v3093_v34 = vcombine.high %v163_v28, %v167_v29  ;;  %v155_v36 = vld [vmem:[#allocation8 + $0xd8] sm:$0xff]  ;;  %v3090_v38 = vcombine.low %v162_v25, %v166_v27  ;;  %v3092_v39 = vcombine.low %v163_v28, %v167_v29  ;;  %v146_v41 = vld [vmem:[#allocation8 + $0x90] sm:$0xff] }
  0x5a   :  { %v159_v37 = vld [vmem:[#allocation8 + $0xf8] sm:$0xff]  ;;  %v3083_v40 = vcombine.high %v154_v33, %v158_v35  ;;  %v150_v42 = vld [vmem:[#allocation8 + $0xb0] sm:$0xff] }
  0x5b   :  { %v3075_v47 = vcombine.high %v146_v41, %v150_v42  ;;  %v138_v48 = vld [vmem:[#allocation8 + $0x50] sm:$0xff]  ;;  %v3468_v1 = vld [vmem:[#allocation11 + $0xe4] ss:$16 sps:$4 sm:$0xff]   ;;  %v3472_v10 = vld [vmem:[#allocation11 + $0xc0] ss:$16 sps:$4 sm:$0xff]  }
  0x5c   :  { %521 = vmatpush1.bf16.msra.mxu0 %v3078_v43  ;;  %562 = vmatpush1.bf16.msra.mxu1 %v3080_v44  ;;  %v147_v43 = vld [vmem:[#allocation8 + $0x98] sm:$0xff]  ;;  %v142_v50 = vld [vmem:[#allocation8 + $0x70] sm:$0xff] }
  0x5d   :  { %522 = vmatprep.subr.bf16.mxu0 %v3071_v45  ;;  %563 = vmatprep.subr.bf16.mxu1 %v3073_v46  ;;  %v151_v44 = vld [vmem:[#allocation8 + $0xb8] sm:$0xff]  ;;  %v3082_v45 = vcombine.low %v154_v33, %v158_v35  ;;  %v3084_v46 = vcombine.low %v155_v36, %v159_v37  ;;  %v130_v56 = vld [vmem:[#allocation8 + $0x10] sm:$0xff] }
  0x5e   :  { %v3077_v49 = vcombine.high %v147_v43, %v151_v44  ;;  %v3076_v54 = vcombine.low %v147_v43, %v151_v44  ;;  %v134_v58 = vld [vmem:[#allocation8 + $0x30] sm:$0xff]  ;;  %v3474_v7 = vld [vmem:[#allocation11 + $0xc4] ss:$16 sps:$4 sm:$0xff]   ;;  %v3475_v11 = vld [vmem:[#allocation11 + $0x2c0] ss:$16 sps:$4 sm:$0xff]  }
  0x5f   :  { %v3058_v2 = vcombine.low %v130_v56, %v134_v58  ;;  %v3480_v13 = vld [vmem:[#allocation11 + $0xa4] ss:$16 sps:$4 sm:$0xff]   ;;  %v3484_v19 = vld [vmem:[#allocation11 + $0x80] ss:$16 sps:$4 sm:$0xff]  }
  0x60   :  { %523 = vmatpush1.bf16.msra.mxu0 %v3070_v51  ;;  %564 = vmatpush1.bf16.msra.mxu1 %v3072_v52  ;;  %v139_v51 = vld [vmem:[#allocation8 + $0x58] sm:$0xff] }
  0x61   :  { %524 = vmatprep.subr.bf16.mxu0 %v3063_v53  ;;  %565 = vmatprep.subr.bf16.mxu1 %v3065_v55  ;;  %v143_v52 = vld [vmem:[#allocation8 + $0x78] sm:$0xff]  ;;  %v3074_v53 = vcombine.low %v146_v41, %v150_v42  ;;  %v3067_v55 = vcombine.high %v138_v48, %v142_v50 }
  0x62   :  { %v3069_v57 = vcombine.high %v139_v51, %v143_v52  ;;  %v3068_v62 = vcombine.low %v139_v51, %v143_v52  ;;  %v3486_v17 = vld [vmem:[#allocation11 + $0x84] ss:$16 sps:$4 sm:$0xff]   ;;  %v3487_v20 = vld [vmem:[#allocation11 + $0x280] ss:$16 sps:$4 sm:$0xff]  }
  0x63   :  { %v3492_v21 = vld [vmem:[#allocation11 + $0x64] ss:$16 sps:$4 sm:$0xff]   ;;  %v3499_v27 = vld [vmem:[#allocation11 + $0x240] ss:$16 sps:$4 sm:$0xff]  }
  0x64   :  { %525 = vmatpush1.bf16.msra.mxu0 %v3062_v59  ;;  %566 = vmatpush1.bf16.msra.mxu1 %v3064_v60  ;;  %v131_v59 = vld [vmem:[#allocation8 + $0x18] sm:$0xff] }
  0x65   :  { %526 = vmatprep.subr.bf16.mxu0 %v3055_v61  ;;  %567 = vmatprep.subr.bf16.mxu1 %v3057_v63  ;;  %v135_v60 = vld [vmem:[#allocation8 + $0x38] sm:$0xff]  ;;  %v3066_v61 = vcombine.low %v138_v48, %v142_v50  ;;  %v3059_v63 = vcombine.high %v130_v56, %v134_v58 }
  0x66   :  { %v3061_v0 = vcombine.high %v131_v59, %v135_v60  ;;  %v3060_v4 = vcombine.low %v131_v59, %v135_v60  ;;  %v3501_v25 = vld [vmem:[#allocation11 + $0x244] ss:$16 sps:$4 sm:$0xff]   ;;  %v3511_v35 = vld [vmem:[#allocation11 + $0x200] ss:$16 sps:$4 sm:$0xff]  }
  0x67   :  { %v3504_v28 = vld [vmem:[#allocation11 + $0x24] ss:$16 sps:$4 sm:$0xff]   ;;  %v3523_v42 = vld [vmem:[#allocation11 + $0x3c0] ss:$16 sps:$4 sm:$0xff]  }
  0x68   :  { %527 = vmatpush1.bf16.msra.mxu0 %v3054_v3  ;;  %568 = vmatpush1.bf16.msra.mxu1 %v3056_v5  ;;  %v3471_v3 = vld [vmem:[#allocation11 + $0x2e4] ss:$16 sps:$4 sm:$0xff]   ;;  %v3466_v5 = vld [vmem:[#allocation11 + $0xe0] ss:$16 sps:$4 sm:$0xff]  }
  0x69   :  { %594 = vmatprep.subr.bf16.mxu0 %v3115_v6  ;;  %635 = vmatprep.subr.bf16.mxu1 %v3117_v9  ;;  %v3469_v6 = vld [vmem:[#allocation11 + $0x2e0] ss:$16 sps:$4 sm:$0xff]   ;;  %v3477_v9 = vld [vmem:[#allocation11 + $0x2c4] ss:$16 sps:$4 sm:$0xff]  }
  0x6a   :  { %v3507_v29 = vld [vmem:[#allocation11 + $0x224] ss:$16 sps:$4 sm:$0xff]   ;;  %v3535_v50 = vld [vmem:[#allocation11 + $0x380] ss:$16 sps:$4 sm:$0xff]  }
  0x6b   :  { %545 = vmatmul.mubr.bf16.vlgmr.msra.gmra.mxu0 %v4099_v12  ;;  %586 = vmatmul.mubr.bf16.vlgmr.msra.gmra.mxu1 %v4099_v12  ;;  %v3513_v33 = vld [vmem:[#allocation11 + $0x204] ss:$16 sps:$4 sm:$0xff]   ;;  %v3547_v58 = vld [vmem:[#allocation11 + $0x340] ss:$16 sps:$4 sm:$0xff]  }
  0x6c   :  { %595 = vmatpush1.bf16.msra.mxu0 %v3114_v14  ;;  %636 = vmatpush1.bf16.msra.mxu1 %v3116_v15  ;;  %v3483_v14 = vld [vmem:[#allocation11 + $0x2a4] ss:$16 sps:$4 sm:$0xff]   ;;  %v3478_v15 = vld [vmem:[#allocation11 + $0xa0] ss:$16 sps:$4 sm:$0xff]  }
  0x6d   :  { %596 = vmatprep.subr.bf16.mxu0 %v3107_v16  ;;  %637 = vmatprep.subr.bf16.mxu1 %v3109_v18  ;;  %v3481_v16 = vld [vmem:[#allocation11 + $0x2a0] ss:$16 sps:$4 sm:$0xff]   ;;  %v3489_v18 = vld [vmem:[#allocation11 + $0x284] ss:$16 sps:$4 sm:$0xff]  }
  0x6e   :  { %626 = vmatprep.mubr.bf16.mxu0 %v4032_v8  ;;  %667 = vmatprep.mubr.bf16.mxu1 %v4032_v8  ;;  %v3085_v8 = vcombine.high %v155_v36, %v159_v37  ;;  %v3516_v36 = vld [vmem:[#allocation11 + $0x1e4] ss:$16 sps:$4 sm:$0xff]  }
  0x6f   :  { %v3519_v37 = vld [vmem:[#allocation11 + $0x3e4] ss:$16 sps:$4 sm:$0xff]  }
  0x70   :  { %597 = vmatpush1.bf16.msra.mxu0 %v3106_v22  ;;  %638 = vmatpush1.bf16.msra.mxu1 %v3108_v23  ;;  %v3495_v22 = vld [vmem:[#allocation11 + $0x264] ss:$16 sps:$4 sm:$0xff]   ;;  %v3493_v23 = vld [vmem:[#allocation11 + $0x260] ss:$16 sps:$4 sm:$0xff]  }
  0x71   :  { %598 = vmatprep.subr.bf16.mxu0 %v3099_v24  ;;  %639 = vmatprep.subr.bf16.mxu1 %v3101_v26  ;;  %v3498_v24 = vld [vmem:[#allocation11 + $0x44] ss:$16 sps:$4 sm:$0xff]   ;;  %v3496_v26 = vld [vmem:[#allocation11 + $0x40] ss:$16 sps:$4 sm:$0xff]  }
  0x72   :  { %v3525_v41 = vld [vmem:[#allocation11 + $0x3c4] ss:$16 sps:$4 sm:$0xff]  }
  0x73   :  { %v3528_v43 = vld [vmem:[#allocation11 + $0x1a4] ss:$16 sps:$4 sm:$0xff]  }
  0x74   :  { %599 = vmatpush1.bf16.msra.mxu0 %v3098_v30  ;;  %640 = vmatpush1.bf16.msra.mxu1 %v3100_v31  ;;  %v3502_v30 = vld [vmem:[#allocation11 + $0x20] ss:$16 sps:$4 sm:$0xff]   ;;  %v3531_v44 = vld [vmem:[#allocation11 + $0x3a4] ss:$16 sps:$4 sm:$0xff]  }
  0x75   :  { %600 = vmatprep.subr.bf16.mxu0 %v3091_v32  ;;  %641 = vmatprep.subr.bf16.mxu1 %v3093_v34  ;;  %v3505_v31 = vld [vmem:[#allocation11 + $0x220] ss:$16 sps:$4 sm:$0xff]   ;;  %v3510_v32 = vld [vmem:[#allocation11 + $0x4] ss:$16 sps:$4 sm:$0xff]  }
  0x76   :  { %v3508_v34 = vld [vmem:[#allocation11] ss:$16 sps:$4 sm:$0xff]   ;;  %v3537_v48 = vld [vmem:[#allocation11 + $0x384] ss:$16 sps:$4 sm:$0xff]  }
  0x77   :  { %v3540_v51 = vld [vmem:[#allocation11 + $0x164] ss:$16 sps:$4 sm:$0xff]  }
  0x78   :  { %601 = vmatpush1.bf16.msra.mxu0 %v3090_v38  ;;  %642 = vmatpush1.bf16.msra.mxu1 %v3092_v39  ;;  %v3514_v38 = vld [vmem:[#allocation11 + $0x1e0] ss:$16 sps:$4 sm:$0xff]   ;;  %v3543_v52 = vld [vmem:[#allocation11 + $0x364] ss:$16 sps:$4 sm:$0xff]  }
  0x79   :  { %602 = vmatprep.subr.bf16.mxu0 %v3083_v40  ;;  %643 = vmatprep.subr.bf16.mxu1 %v3085_v8  ;;  %v3517_v39 = vld [vmem:[#allocation11 + $0x3e0] ss:$16 sps:$4 sm:$0xff]   ;;  %v3522_v40 = vld [vmem:[#allocation11 + $0x1c4] ss:$16 sps:$4 sm:$0xff]  }
  0x7a   :  { %v3520_v8 = vld [vmem:[#allocation11 + $0x1c0] ss:$16 sps:$4 sm:$0xff]   ;;  %v3549_v56 = vld [vmem:[#allocation11 + $0x344] ss:$16 sps:$4 sm:$0xff]  }
  0x7b   :  { %v3552_v59 = vld [vmem:[#allocation11 + $0x124] ss:$16 sps:$4 sm:$0xff]  }
  0x7c   :  { %603 = vmatpush1.bf16.msra.mxu0 %v3082_v45  ;;  %644 = vmatpush1.bf16.msra.mxu1 %v3084_v46  ;;  %v3526_v45 = vld [vmem:[#allocation11 + $0x1a0] ss:$16 sps:$4 sm:$0xff]   ;;  %v3555_v60 = vld [vmem:[#allocation11 + $0x324] ss:$16 sps:$4 sm:$0xff]  }
  0x7d   :  { %604 = vmatprep.subr.bf16.mxu0 %v3075_v47  ;;  %645 = vmatprep.subr.bf16.mxu1 %v3077_v49  ;;  %v3529_v46 = vld [vmem:[#allocation11 + $0x3a0] ss:$16 sps:$4 sm:$0xff]   ;;  %v3534_v47 = vld [vmem:[#allocation11 + $0x184] ss:$16 sps:$4 sm:$0xff]  }
  0x7e   :  { %v3532_v49 = vld [vmem:[#allocation11 + $0x180] ss:$16 sps:$4 sm:$0xff]  }
  0x80   :  { %605 = vmatpush1.bf16.msra.mxu0 %v3074_v53  ;;  %646 = vmatpush1.bf16.msra.mxu1 %v3076_v54  ;;  %v3538_v53 = vld [vmem:[#allocation11 + $0x160] ss:$16 sps:$4 sm:$0xff]  }
  0x81   :  { %606 = vmatprep.subr.bf16.mxu0 %v3067_v55  ;;  %647 = vmatprep.subr.bf16.mxu1 %v3069_v57  ;;  %v3541_v54 = vld [vmem:[#allocation11 + $0x360] ss:$16 sps:$4 sm:$0xff]   ;;  %v3546_v55 = vld [vmem:[#allocation11 + $0x144] ss:$16 sps:$4 sm:$0xff]  }
  0x82   :  { %v3544_v57 = vld [vmem:[#allocation11 + $0x140] ss:$16 sps:$4 sm:$0xff]  }
  0x84   :  { %607 = vmatpush1.bf16.msra.mxu0 %v3066_v61  ;;  %648 = vmatpush1.bf16.msra.mxu1 %v3068_v62  ;;  %v3550_v61 = vld [vmem:[#allocation11 + $0x120] ss:$16 sps:$4 sm:$0xff]  }
  0x85   :  { %608 = vmatprep.subr.bf16.mxu0 %v3059_v63  ;;  %649 = vmatprep.subr.bf16.mxu1 %v3061_v0  ;;  %v3553_v62 = vld [vmem:[#allocation11 + $0x320] ss:$16 sps:$4 sm:$0xff]   ;;  %v3558_v63 = vld [vmem:[#allocation11 + $0x104] ss:$16 sps:$4 sm:$0xff]  }
  0x86   :  { %v3561_v0 = vld [vmem:[#allocation11 + $0x304] ss:$16 sps:$4 sm:$0xff]  }
  0x88   :  { %609 = vmatpush1.bf16.msra.mxu0 %v3058_v2  ;;  %650 = vmatpush1.bf16.msra.mxu1 %v3060_v4  ;;  %v3559_v2 = vld [vmem:[#allocation11 + $0x300] ss:$16 sps:$4 sm:$0xff]   ;;  %v3567_v4 = vld [vmem:[#allocation11 + $0x6e4] ss:$16 sps:$4 sm:$0xff]  }
  0x89   :  { %2346 = vmatprep.subr.bf16.mxu0 %v3468_v1  ;;  %2387 = vmatprep.subr.bf16.mxu1 %v3471_v3  ;;  %v3556_v1 = vld [vmem:[#allocation11 + $0x100] ss:$16 sps:$4 sm:$0xff]   ;;  %v3564_v3 = vld [vmem:[#allocation11 + $0x4e4] ss:$16 sps:$4 sm:$0xff]  }
  0x8b   :  { %627 = vmatmul.mubr.bf16.vlgmr.msra.gmra.mxu0 %v4099_v12  ;;  %668 = vmatmul.mubr.bf16.vlgmr.msra.gmra.mxu1 %v4099_v12  ;;  %v3490_v12 = vld [vmem:[#allocation11 + $0x60] ss:$16 sps:$4 sm:$0xff]  }
  0x8c   :  { %2347 = vmatpush1.bf16.msra.mxu0 %v3466_v5  ;;  %2388 = vmatpush1.bf16.msra.mxu1 %v3469_v6  ;;  %v707_v5 = vlaneseq }
  0x8d   :  { %2348 = vmatprep.subr.bf16.mxu0 %v3474_v7  ;;  %2389 = vmatprep.subr.bf16.mxu1 %v3477_v9  ;;  %v4110_v9 = vld [vmem:[#allocation10] sm:$0xff] }
  0x8e   :  { %v4107_v6 = vshrl.u32 %v707_v5, 7  ;;  %v3600_v5 = vld [vmem:[#allocation11 + $0x424] ss:$16 sps:$4 sm:$0xff]  }
  0x90   :  { %2349 = vmatpush1.bf16.msra.mxu0 %v3472_v10  ;;  %2390 = vmatpush1.bf16.msra.mxu1 %v3475_v11  ;;  %v725_v7 = vsub.s32 4, %v4107_v6  ;;  %v733_v11 = vsub.s32 6, %v4107_v6 }
  0x91   :  { %2350 = vmatprep.subr.bf16.mxu0 %v3480_v13  ;;  %2391 = vmatprep.subr.bf16.mxu1 %v3483_v14  ;;  %v709_v14 = vsub.s32 0, %v4107_v6 }
  0x92   :  { %v4113_v10 = vrot.slane %v4110_v9, %v725_v7  ;;  %v4117_v13 = vrot.slane %v4110_v9, %v733_v11  ;;  %v3603_v7 = vld [vmem:[#allocation11 + $0x624] ss:$16 sps:$4 sm:$0xff]  }
  0x94   :  { %2351 = vmatpush1.bf16.msra.mxu0 %v3478_v15  ;;  %2392 = vmatpush1.bf16.msra.mxu1 %v3481_v16  ;;  %v717_v15 = vsub.s32 2, %v4107_v6  ;;  %v713_v16 = vsub.s32 1, %v4107_v6 }
  0x95   :  { %2352 = vmatprep.subr.bf16.mxu0 %v3486_v17  ;;  %2393 = vmatprep.subr.bf16.mxu1 %v3489_v18  ;;  %v721_v17 = vsub.s32 3, %v4107_v6  ;;  %v710_v18 = vrot.slane %v4110_v9, %v709_v14 }
  0x98   :  { %2353 = vmatpush1.bf16.msra.mxu0 %v3484_v19  ;;  %2394 = vmatpush1.bf16.msra.mxu1 %v3487_v20  ;;  %v718_v19 = vrot.slane %v4110_v9, %v717_v15  ;;  %v714_v20 = vrot.slane %v4110_v9, %v713_v16 }
  0x99   :  { %2354 = vmatprep.subr.bf16.mxu0 %v3492_v21  ;;  %2395 = vmatprep.subr.bf16.mxu1 %v3495_v22  ;;  %v4132_v22 = vstv %s695_s3 }
  0x9c   :  { %2355 = vmatpush1.bf16.msra.mxu0 %v3490_v12  ;;  %2396 = vmatpush1.bf16.msra.mxu1 %v3493_v23  ;;  %v722_v12 = vrot.slane %v4110_v9, %v721_v17 }
  0x9d   :  { %2356 = vmatprep.subr.bf16.mxu0 %v3498_v24  ;;  %2397 = vmatprep.subr.bf16.mxu1 %v3501_v25 }
  0xa0   :  { %2357 = vmatpush1.bf16.msra.mxu0 %v3496_v26  ;;  %2398 = vmatpush1.bf16.msra.mxu1 %v3499_v27 }
  0xa1   :  { %2358 = vmatprep.subr.bf16.mxu0 %v3504_v28  ;;  %2399 = vmatprep.subr.bf16.mxu1 %v3507_v29 }
  0xa4   :  { %2359 = vmatpush1.bf16.msra.mxu0 %v3502_v30  ;;  %2400 = vmatpush1.bf16.msra.mxu1 %v3505_v31 }
  0xa5   :  { %2360 = vmatprep.subr.bf16.mxu0 %v3510_v32  ;;  %2401 = vmatprep.subr.bf16.mxu1 %v3513_v33 }
  0xa8   :  { %2361 = vmatpush1.bf16.msra.mxu0 %v3508_v34  ;;  %2402 = vmatpush1.bf16.msra.mxu1 %v3511_v35 }
  0xa9   :  { %2362 = vmatprep.subr.bf16.mxu0 %v3516_v36  ;;  %2403 = vmatprep.subr.bf16.mxu1 %v3519_v37 }
  0xac   :  { %2363 = vmatpush2.bf16.msra.mxu0 %v3514_v38  ;;  %2404 = vmatpush2.bf16.msra.mxu1 %v3517_v39 }
  0xad   :  { %2364 = vmatprep.subr.bf16.mxu0 %v3522_v40  ;;  %2405 = vmatprep.subr.bf16.mxu1 %v3525_v41 }
  0xb0   :  { %2365 = vmatpush2.bf16.msra.mxu0 %v3520_v8  ;;  %2406 = vmatpush2.bf16.msra.mxu1 %v3523_v42  ;;  %v3562_v42 = vld [vmem:[#allocation11 + $0x4e0] ss:$16 sps:$4 sm:$0xff]  }
  0xb1   :  { %2366 = vmatprep.subr.bf16.mxu0 %v3528_v43  ;;  %2407 = vmatprep.subr.bf16.mxu1 %v3531_v44 }
  0xb4   :  { %2367 = vmatpush2.bf16.msra.mxu0 %v3526_v45  ;;  %2408 = vmatpush2.bf16.msra.mxu1 %v3529_v46  ;;  %v3565_v45 = vld [vmem:[#allocation11 + $0x6e0] ss:$16 sps:$4 sm:$0xff]   ;;  %v3570_v46 = vld [vmem:[#allocation11 + $0x4c4] ss:$16 sps:$4 sm:$0xff]  }
  0xb5   :  { %2368 = vmatprep.subr.bf16.mxu0 %v3534_v47  ;;  %2409 = vmatprep.subr.bf16.mxu1 %v3537_v48  ;;  %v3573_v48 = vld [vmem:[#allocation11 + $0x6c4] ss:$16 sps:$4 sm:$0xff]  }
  0xb8   :  { %2369 = vmatpush2.bf16.msra.mxu0 %v3532_v49  ;;  %2410 = vmatpush2.bf16.msra.mxu1 %v3535_v50  ;;  %v3568_v49 = vld [vmem:[#allocation11 + $0x4c0] ss:$16 sps:$4 sm:$0xff]  }
  0xb9   :  { %2370 = vmatprep.subr.bf16.mxu0 %v3540_v51  ;;  %2411 = vmatprep.subr.bf16.mxu1 %v3543_v52  ;;  %v3571_v50 = vld [vmem:[#allocation11 + $0x6c0] ss:$16 sps:$4 sm:$0xff]   ;;  %v3576_v51 = vld [vmem:[#allocation11 + $0x4a4] ss:$16 sps:$4 sm:$0xff]  }
  0xba   :  { %v3579_v52 = vld [vmem:[#allocation11 + $0x6a4] ss:$16 sps:$4 sm:$0xff]  }
  0xbc   :  { %2371 = vmatpush2.bf16.msra.mxu0 %v3538_v53  ;;  %2412 = vmatpush2.bf16.msra.mxu1 %v3541_v54  ;;  %v3574_v53 = vld [vmem:[#allocation11 + $0x4a0] ss:$16 sps:$4 sm:$0xff]  }
  0xbd   :  { %2372 = vmatprep.subr.bf16.mxu0 %v3546_v55  ;;  %2413 = vmatprep.subr.bf16.mxu1 %v3549_v56  ;;  %v3577_v54 = vld [vmem:[#allocation11 + $0x6a0] ss:$16 sps:$4 sm:$0xff]   ;;  %v3582_v55 = vld [vmem:[#allocation11 + $0x484] ss:$16 sps:$4 sm:$0xff]  }
  0xbe   :  { %v3585_v56 = vld [vmem:[#allocation11 + $0x684] ss:$16 sps:$4 sm:$0xff]  }
  0xc0   :  { %2373 = vmatpush2.bf16.msra.mxu0 %v3544_v57  ;;  %2414 = vmatpush2.bf16.msra.mxu1 %v3547_v58  ;;  %v3580_v57 = vld [vmem:[#allocation11 + $0x480] ss:$16 sps:$4 sm:$0xff]  }
  0xc1   :  { %2374 = vmatprep.subr.bf16.mxu0 %v3552_v59  ;;  %2415 = vmatprep.subr.bf16.mxu1 %v3555_v60  ;;  %v3583_v58 = vld [vmem:[#allocation11 + $0x680] ss:$16 sps:$4 sm:$0xff]   ;;  %v3588_v59 = vld [vmem:[#allocation11 + $0x464] ss:$16 sps:$4 sm:$0xff]  }
  0xc2   :  { %v3591_v60 = vld [vmem:[#allocation11 + $0x664] ss:$16 sps:$4 sm:$0xff]  }
  0xc4   :  { %2375 = vmatpush2.bf16.msra.mxu0 %v3550_v61  ;;  %2416 = vmatpush2.bf16.msra.mxu1 %v3553_v62  ;;  %v3586_v61 = vld [vmem:[#allocation11 + $0x460] ss:$16 sps:$4 sm:$0xff]  }
  0xc5   :  { %2376 = vmatprep.subr.bf16.mxu0 %v3558_v63  ;;  %2417 = vmatprep.subr.bf16.mxu1 %v3561_v0  ;;  %v3589_v62 = vld [vmem:[#allocation11 + $0x660] ss:$16 sps:$4 sm:$0xff]   ;;  %v3594_v63 = vld [vmem:[#allocation11 + $0x444] ss:$16 sps:$4 sm:$0xff]  }
  0xc6   :  { %v3597_v0 = vld [vmem:[#allocation11 + $0x644] ss:$16 sps:$4 sm:$0xff]  }
  0xc8   :  { %2377 = vmatpush2.bf16.msra.mxu0 %v3556_v1  ;;  %2418 = vmatpush2.bf16.msra.mxu1 %v3559_v2  ;;  %v729_v1 = vsub.s32 5, %v4107_v6  ;;  %v3592_v2 = vld [vmem:[#allocation11 + $0x440] ss:$16 sps:$4 sm:$0xff]  }
  0xc9   :  { %2428 = vmatprep.subr.bf16.mxu0 %v3564_v3  ;;  %2469 = vmatprep.subr.bf16.mxu1 %v3567_v4  ;;  %v737_v3 = vsub.s32 7, %v4107_v6  ;;  %v3595_v4 = vld [vmem:[#allocation11 + $0x640] ss:$16 sps:$4 sm:$0xff]  }
  0xca   :  { %v730_v11 = vrot.slane %v4110_v9, %v729_v1  ;;  %v3637_v1 = vld [vmem:[#allocation11 + $0x760] ss:$16 sps:$4 sm:$0xff]  }
 0x12b   :  { %v546_v21 = vpop.f32.mrf.mxu0  ;;  %v587_v24 = vpop.f32.mrf.mxu1 }
 0x12c   :  { %v747_v23 = vadd.f32 %v710_v18, %v546_v21  ;;  %v749_v25 = vadd.f32 %v718_v19, %v587_v24  ;;  %v3598_v18 = vld [vmem:[#allocation11 + $0x420] ss:$16 sps:$4 sm:$0xff]  }
 0x12d   :  { %v548_v26 = vpop.f32.mrf.mxu0  ;;  %v589_v29 = vpop.f32.mrf.mxu1  ;;  %v3601_v21 = vld [vmem:[#allocation11 + $0x620] ss:$16 sps:$4 sm:$0xff]  }
 0x12e   :  { %vm755_vm0 = vcmp.ge.f32.partialorder %v747_v23, 0.0  ;;  %v764_v27 = vmul.f32 %v4132_v22, %v747_v23  ;;  %v748_v28 = vadd.f32 %v714_v20, %v548_v26  ;;  %vm757_vm1 = vcmp.ge.f32.partialorder %v749_v25, 0.0 }
 0x12f   :  { %v766_v30 = vmul.f32 %v4132_v22, %v749_v25  ;;  %v750_v31 = vadd.f32 %v722_v12, %v589_v29  ;;  %v550_v32 = vpop.f32.mrf.mxu0  ;;  %v591_v34 = vpop.f32.mrf.mxu1  ;;  %v738_v20 = vrot.slane %v4110_v9, %v737_v3  ;;  %v3606_v12 = vld [vmem:[#allocation11 + $0x404] ss:$16 sps:$4 sm:$0xff]  }
 0x130   :  { %vm756_vm2 = vcmp.ge.f32.partialorder %v748_v28, 0.0  ;;  %v765_v33 = vmul.f32 %v4132_v22, %v748_v28  ;;  %v772_v35 = vsel %vm755_vm0, %v747_v23, %v764_v27  ;;  %v3612_v34 = vld [vmem:[#allocation11 + $0x5e4] ss:$16 sps:$4 sm:$0xff]  }
 0x131   :  { %vm758_vm3 = vcmp.ge.f32.partialorder %v750_v31, 0.0  ;;  %v767_v36 = vmul.f32 %v4132_v22, %v750_v31  ;;  %v551_v37 = vpop.f32.mrf.mxu0  ;;  %v774_v38 = vsel %vm757_vm1, %v749_v25, %v766_v30  ;;  %v592_v39 = vpop.f32.mrf.mxu1  ;;  %v4143_v43 = vpack.c.bf16 %v772_v35, %v772_v35  ;;  %v3609_v25 = vld [vmem:[#allocation11 + $0x604] ss:$16 sps:$4 sm:$0xff]  }
 0x132   :  { %v773_v40 = vsel %vm756_vm2, %v748_v28, %v765_v33  ;;  %v4147_v47 = vpack.c.bf16 %v774_v38, %v774_v38  ;;  %v3615_v37 = vld [vmem:[#allocation11 + $0x7e4] ss:$16 sps:$4 sm:$0xff]  }
 0x133   :  { %v4141_v41 = vpack.c.bf16 %v773_v40, %v773_v40  ;;  %v775_v8 = vsel %vm758_vm3, %v750_v31, %v767_v36  ;;  %v3604_v31 = vld [vmem:[#allocation11 + $0x400] ss:$16 sps:$4 sm:$0xff]   ;;  %v3645_v3 = vld [vmem:[#allocation11 + $0x744] ss:$16 sps:$4 sm:$0xff]  }
 0x134   :  { %v4145_v44 = vpack.c.bf16 %v775_v8, %v775_v8 }
 0x135   :  { %2378 = vmatprep.mubr.bf16.mxu0 %v4141_v41 }
 0x136   :  { %2419 = vmatprep.mubr.bf16.mxu1 %v4145_v44  ;;  %2379 = vmatmul.mubr.bf16.vlgmr.msra.gmra.mxu0 %v4143_v43 }
 0x137   :  { %2420 = vmatmul.mubr.bf16.vlgmr.msra.gmra.mxu1 %v4147_v47  ;;  %2429 = vmatpush1.bf16.msra.mxu0 %v3562_v42 }
 0x138   :  { %2470 = vmatpush1.bf16.msra.mxu1 %v3565_v45  ;;  %2430 = vmatprep.subr.bf16.mxu0 %v3570_v46  ;;  %v3610_v45 = vld [vmem:[#allocation11 + $0x5e0] ss:$16 sps:$4 sm:$0xff]  }
 0x139   :  { %2471 = vmatprep.subr.bf16.mxu1 %v3573_v48 }
 0x13b   :  { %2431 = vmatpush1.bf16.msra.mxu0 %v3568_v49  ;;  %v3613_v49 = vld [vmem:[#allocation11 + $0x7e0] ss:$16 sps:$4 sm:$0xff]  }
 0x13c   :  { %2472 = vmatpush1.bf16.msra.mxu1 %v3571_v50  ;;  %2432 = vmatprep.subr.bf16.mxu0 %v3576_v51  ;;  %v3618_v50 = vld [vmem:[#allocation11 + $0x5c4] ss:$16 sps:$4 sm:$0xff]  }
 0x13d   :  { %2473 = vmatprep.subr.bf16.mxu1 %v3579_v52  ;;  %v3621_v52 = vld [vmem:[#allocation11 + $0x7c4] ss:$16 sps:$4 sm:$0xff]  }
 0x13f   :  { %2433 = vmatpush1.bf16.msra.mxu0 %v3574_v53  ;;  %v3619_v53 = vld [vmem:[#allocation11 + $0x7c0] ss:$16 sps:$4 sm:$0xff]  }
 0x140   :  { %2474 = vmatpush1.bf16.msra.mxu1 %v3577_v54  ;;  %2434 = vmatprep.subr.bf16.mxu0 %v3582_v55  ;;  %v3624_v54 = vld [vmem:[#allocation11 + $0x5a4] ss:$16 sps:$4 sm:$0xff]  }
 0x141   :  { %2475 = vmatprep.subr.bf16.mxu1 %v3585_v56  ;;  %v3627_v55 = vld [vmem:[#allocation11 + $0x7a4] ss:$16 sps:$4 sm:$0xff]   ;;  %v3622_v56 = vld [vmem:[#allocation11 + $0x5a0] ss:$16 sps:$4 sm:$0xff]  }
 0x143   :  { %2435 = vmatpush1.bf16.msra.mxu0 %v3580_v57  ;;  %v3625_v57 = vld [vmem:[#allocation11 + $0x7a0] ss:$16 sps:$4 sm:$0xff]  }
 0x144   :  { %2476 = vmatpush1.bf16.msra.mxu1 %v3583_v58  ;;  %2436 = vmatprep.subr.bf16.mxu0 %v3588_v59  ;;  %v3630_v58 = vld [vmem:[#allocation11 + $0x584] ss:$16 sps:$4 sm:$0xff]  }
 0x145   :  { %2477 = vmatprep.subr.bf16.mxu1 %v3591_v60  ;;  %v3633_v59 = vld [vmem:[#allocation11 + $0x784] ss:$16 sps:$4 sm:$0xff]   ;;  %v3628_v60 = vld [vmem:[#allocation11 + $0x580] ss:$16 sps:$4 sm:$0xff]  }
 0x147   :  { %2437 = vmatpush1.bf16.msra.mxu0 %v3586_v61  ;;  %v3631_v61 = vld [vmem:[#allocation11 + $0x780] ss:$16 sps:$4 sm:$0xff]  }
 0x148   :  { %2478 = vmatpush1.bf16.msra.mxu1 %v3589_v62  ;;  %2438 = vmatprep.subr.bf16.mxu0 %v3594_v63  ;;  %v3636_v62 = vld [vmem:[#allocation11 + $0x564] ss:$16 sps:$4 sm:$0xff]  }
 0x149   :  { %2479 = vmatprep.subr.bf16.mxu1 %v3597_v0  ;;  %v3639_v63 = vld [vmem:[#allocation11 + $0x764] ss:$16 sps:$4 sm:$0xff]   ;;  %v3634_v0 = vld [vmem:[#allocation11 + $0x560] ss:$16 sps:$4 sm:$0xff]  }
 0x14b   :  { %2439 = vmatpush1.bf16.msra.mxu0 %v3592_v2  ;;  %v628_v19 = vpop.f32.mrf.mxu0  ;;  %v669_v24 = vpop.f32.mrf.mxu1  ;;  %v3642_v2 = vld [vmem:[#allocation11 + $0x544] ss:$16 sps:$4 sm:$0xff]  }
 0x14c   :  { %2480 = vmatpush1.bf16.msra.mxu1 %v3595_v4  ;;  %2440 = vmatprep.subr.bf16.mxu0 %v3600_v5  ;;  %v751_v23 = vadd.f32 %v4113_v10, %v628_v19  ;;  %v753_v27 = vadd.f32 %v4117_v13, %v669_v24  ;;  %v3607_v10 = vld [vmem:[#allocation11 + $0x600] ss:$16 sps:$4 sm:$0xff]   ;;  %v3660_v24 = vld [vmem:[#allocation11 + $0xec] ss:$16 sps:$4 sm:$0xff]  }
 0x14d   :  { %2481 = vmatprep.subr.bf16.mxu1 %v3603_v7  ;;  %v630_v26 = vpop.f32.mrf.mxu0  ;;  %v671_v30 = vpop.f32.mrf.mxu1  ;;  %v3640_v4 = vld [vmem:[#allocation11 + $0x540] ss:$16 sps:$4 sm:$0xff]   ;;  %v3648_v7 = vld [vmem:[#allocation11 + $0x524] ss:$16 sps:$4 sm:$0xff]  }
 0x14e   :  { %vm759_vm4 = vcmp.ge.f32.partialorder %v751_v23, 0.0  ;;  %v768_v28 = vmul.f32 %v4132_v22, %v751_v23  ;;  %v752_v29 = vadd.f32 %v730_v11, %v630_v26  ;;  %vm761_vm5 = vcmp.ge.f32.partialorder %v753_v27, 0.0  ;;  %v3643_v5 = vld [vmem:[#allocation11 + $0x740] ss:$16 sps:$4 sm:$0xff]   ;;  %v3651_v11 = vld [vmem:[#allocation11 + $0x724] ss:$16 sps:$4 sm:$0xff]  }
 0x14f   :  { %2441 = vmatpush1.bf16.msra.mxu0 %v3598_v18  ;;  %v770_v9 = vmul.f32 %v4132_v22, %v753_v27  ;;  %v632_v32 = vpop.f32.mrf.mxu0  ;;  %v754_v33 = vadd.f32 %v738_v20, %v671_v30  ;;  %v673_v36 = vpop.f32.mrf.mxu1  ;;  %v3646_v18 = vld [vmem:[#allocation11 + $0x520] ss:$16 sps:$4 sm:$0xff]   ;;  %v3654_v20 = vld [vmem:[#allocation11 + $0x504] ss:$16 sps:$4 sm:$0xff]   ;;  %v3658_v26 = vld [vmem:[#allocation11 + $0xe8] ss:$16 sps:$4 sm:$0xff]  }
 0x150   :  { %2482 = vmatpush1.bf16.msra.mxu1 %v3601_v21  ;;  %2442 = vmatprep.subr.bf16.mxu0 %v3606_v12  ;;  %v4161_v35 = vsel %vm759_vm4, %v751_v23, %v768_v28  ;;  %vm760_vm6 = vcmp.ge.f32.partialorder %v752_v29, 0.0  ;;  %v769_v13 = vmul.f32 %v4132_v22, %v752_v29  ;;  %v3649_v19 = vld [vmem:[#allocation11 + $0x720] ss:$16 sps:$4 sm:$0xff]   ;;  %v3657_v21 = vld [vmem:[#allocation11 + $0x704] ss:$16 sps:$4 sm:$0xff]  }
 0x151   :  { %2483 = vmatprep.subr.bf16.mxu1 %v3609_v25  ;;  %v4164_v38 = vsel %vm761_vm5, %v753_v27, %v770_v9  ;;  %vm762_vm7 = vcmp.ge.f32.partialorder %v754_v33, 0.0  ;;  %v771_v39 = vmul.f32 %v4132_v22, %v754_v33  ;;  %v633_v40 = vpop.f32.mrf.mxu0  ;;  %v674_v8 = vpop.f32.mrf.mxu1  ;;  %v3616_v22 = vld [vmem:[#allocation11 + $0x5c0] ss:$16 sps:$4 sm:$0xff]   ;;  %v3663_v25 = vld [vmem:[#allocation11 + $0x2ec] ss:$16 sps:$4 sm:$0xff]   ;;  %v4175_v27 = vpack.c.bf16 %v4161_v35, %v4161_v35 }
 0x152   :  { %v777_v42 = vsel %vm760_vm6, %v752_v29, %v769_v13  ;;  %v3652_v12 = vld [vmem:[#allocation11 + $0x500] ss:$16 sps:$4 sm:$0xff]   ;;  %v3661_v28 = vld [vmem:[#allocation11 + $0x2e8] ss:$16 sps:$4 sm:$0xff]   ;;  %v4179_v29 = vpack.c.bf16 %v4164_v38, %v4164_v38  ;;  %v3666_v30 = vld [vmem:[#allocation11 + $0xcc] ss:$16 sps:$4 sm:$0xff]  }
 0x153   :  { %2443 = vmatpush1.bf16.msra.mxu0 %v3604_v31  ;;  %v4167_v46 = vpack.c.bf16 %v777_v42, %v777_v42  ;;  %v779_v48 = vsel %vm762_vm7, %v754_v33, %v771_v39  ;;  %v3655_v23 = vld [vmem:[#allocation11 + $0x700] ss:$16 sps:$4 sm:$0xff]   ;;  %v3669_v31 = vld [vmem:[#allocation11 + $0x2cc] ss:$16 sps:$4 sm:$0xff]   ;;  %v3664_v9 = vld [vmem:[#allocation11 + $0xc8] ss:$16 sps:$4 sm:$0xff]  }
 0x154   :  { %2484 = vmatpush1.bf16.msra.mxu1 %v3607_v10  ;;  %2444 = vmatprep.subr.bf16.mxu0 %v3612_v34  ;;  %v4169_v51 = vpack.c.bf16 %v779_v48, %v779_v48  ;;  %v3667_v32 = vld [vmem:[#allocation11 + $0x2c8] ss:$16 sps:$4 sm:$0xff]   ;;  %v3672_v33 = vld [vmem:[#allocation11 + $0xac] ss:$16 sps:$4 sm:$0xff]  }
 0x155   :  { %2485 = vmatprep.subr.bf16.mxu1 %v3615_v37  ;;  %2460 = vmatprep.mubr.bf16.mxu0 %v4167_v46  ;;  %v3675_v10 = vld [vmem:[#allocation11 + $0x2ac] ss:$16 sps:$4 sm:$0xff]   ;;  %v3670_v34 = vld [vmem:[#allocation11 + $0xa8] ss:$16 sps:$4 sm:$0xff]  }
 0x156   :  { %2501 = vmatprep.mubr.bf16.mxu1 %v4169_v51  ;;  %v3673_v35 = vld [vmem:[#allocation11 + $0x2a8] ss:$16 sps:$4 sm:$0xff]   ;;  %v3678_v13 = vld [vmem:[#allocation11 + $0x8c] ss:$16 sps:$4 sm:$0xff]  }
 0x157   :  { %2445 = vmatpush2.bf16.msra.mxu0 %v3610_v45  ;;  %v3681_v36 = vld [vmem:[#allocation11 + $0x28c] ss:$16 sps:$4 sm:$0xff]   ;;  %v3676_v37 = vld [vmem:[#allocation11 + $0x88] ss:$16 sps:$4 sm:$0xff]  }
 0x158   :  { %2486 = vmatpush2.bf16.msra.mxu1 %v3613_v49  ;;  %2446 = vmatprep.subr.bf16.mxu0 %v3618_v50  ;;  %v3684_v38 = vld [vmem:[#allocation11 + $0x6c] ss:$16 sps:$4 sm:$0xff]   ;;  %v3685_v40 = vld [vmem:[#allocation11 + $0x268] ss:$16 sps:$4 sm:$0xff]  }
 0x159   :  { %2487 = vmatprep.subr.bf16.mxu1 %v3621_v52  ;;  %v3687_v39 = vld [vmem:[#allocation11 + $0x26c] ss:$16 sps:$4 sm:$0xff]   ;;  %v3688_v45 = vld [vmem:[#allocation11 + $0x48] ss:$16 sps:$4 sm:$0xff]  }
 0x15a   :  { %v3690_v8 = vld [vmem:[#allocation11 + $0x4c] ss:$16 sps:$4 sm:$0xff]   ;;  %v3691_v48 = vld [vmem:[#allocation11 + $0x248] ss:$16 sps:$4 sm:$0xff]  }
 0x15b   :  { %2447 = vmatpush2.bf16.msra.mxu0 %v3616_v22  ;;  %v3693_v42 = vld [vmem:[#allocation11 + $0x24c] ss:$16 sps:$4 sm:$0xff]   ;;  %v3694_v52 = vld [vmem:[#allocation11 + $0x28] ss:$16 sps:$4 sm:$0xff]  }
 0x15c   :  { %2488 = vmatpush2.bf16.msra.mxu1 %v3619_v53  ;;  %2448 = vmatprep.subr.bf16.mxu0 %v3624_v54  ;;  %v3696_v49 = vld [vmem:[#allocation11 + $0x2c] ss:$16 sps:$4 sm:$0xff]   ;;  %v3697_v22 = vld [vmem:[#allocation11 + $0x228] ss:$16 sps:$4 sm:$0xff]  }
 0x15d   :  { %2489 = vmatprep.subr.bf16.mxu1 %v3627_v55  ;;  %v3699_v50 = vld [vmem:[#allocation11 + $0x22c] ss:$16 sps:$4 sm:$0xff]   ;;  %v3700_v55 = vld [vmem:[#allocation11 + $0x8] ss:$16 sps:$4 sm:$0xff]  }
 0x15e   :  { %v3702_v53 = vld [vmem:[#allocation11 + $0xc] ss:$16 sps:$4 sm:$0xff]  }
 0x15f   :  { %2449 = vmatpush2.bf16.msra.mxu0 %v3622_v56  ;;  %v3705_v54 = vld [vmem:[#allocation11 + $0x20c] ss:$16 sps:$4 sm:$0xff]   ;;  %v3703_v56 = vld [vmem:[#allocation11 + $0x208] ss:$16 sps:$4 sm:$0xff]  }
 0x160   :  { %2490 = vmatpush2.bf16.msra.mxu1 %v3625_v57  ;;  %2450 = vmatprep.subr.bf16.mxu0 %v3630_v58  ;;  %v3708_v57 = vld [vmem:[#allocation11 + $0x1ec] ss:$16 sps:$4 sm:$0xff]  }
 0x161   :  { %2491 = vmatprep.subr.bf16.mxu1 %v3633_v59  ;;  %v3711_v58 = vld [vmem:[#allocation11 + $0x3ec] ss:$16 sps:$4 sm:$0xff]   ;;  %v3706_v59 = vld [vmem:[#allocation11 + $0x1e8] ss:$16 sps:$4 sm:$0xff]  }
 0x163   :  { %2451 = vmatpush2.bf16.msra.mxu0 %v3628_v60  ;;  %v3709_v60 = vld [vmem:[#allocation11 + $0x3e8] ss:$16 sps:$4 sm:$0xff]  }
 0x164   :  { %2492 = vmatpush2.bf16.msra.mxu1 %v3631_v61  ;;  %2452 = vmatprep.subr.bf16.mxu0 %v3636_v62  ;;  %v3714_v61 = vld [vmem:[#allocation11 + $0x1cc] ss:$16 sps:$4 sm:$0xff]  }
 0x165   :  { %2493 = vmatprep.subr.bf16.mxu1 %v3639_v63  ;;  %v3717_v62 = vld [vmem:[#allocation11 + $0x3cc] ss:$16 sps:$4 sm:$0xff]   ;;  %v3712_v63 = vld [vmem:[#allocation11 + $0x1c8] ss:$16 sps:$4 sm:$0xff]  }
 0x167   :  { %2453 = vmatpush2.bf16.msra.mxu0 %v3634_v0  ;;  %v3715_v0 = vld [vmem:[#allocation11 + $0x3c8] ss:$16 sps:$4 sm:$0xff]  }
 0x168   :  { %2494 = vmatpush2.bf16.msra.mxu1 %v3637_v1  ;;  %2454 = vmatprep.subr.bf16.mxu0 %v3642_v2  ;;  %v3720_v1 = vld [vmem:[#allocation11 + $0x1ac] ss:$16 sps:$4 sm:$0xff]  }
 0x169   :  { %2495 = vmatprep.subr.bf16.mxu1 %v3645_v3  ;;  %v3723_v2 = vld [vmem:[#allocation11 + $0x3ac] ss:$16 sps:$4 sm:$0xff]   ;;  %v3718_v3 = vld [vmem:[#allocation11 + $0x1a8] ss:$16 sps:$4 sm:$0xff]  }
 0x16b   :  { %2455 = vmatpush2.bf16.msra.mxu0 %v3640_v4  ;;  %v3721_v4 = vld [vmem:[#allocation11 + $0x3a8] ss:$16 sps:$4 sm:$0xff]  }
 0x16c   :  { %2496 = vmatpush2.bf16.msra.mxu1 %v3643_v5  ;;  %2456 = vmatprep.subr.bf16.mxu0 %v3648_v7  ;;  %v3726_v5 = vld [vmem:[#allocation11 + $0x18c] ss:$16 sps:$4 sm:$0xff]  }
 0x16d   :  { %2497 = vmatprep.subr.bf16.mxu1 %v3651_v11  ;;  %v3729_v7 = vld [vmem:[#allocation11 + $0x38c] ss:$16 sps:$4 sm:$0xff]   ;;  %v3724_v11 = vld [vmem:[#allocation11 + $0x188] ss:$16 sps:$4 sm:$0xff]  }
 0x16f   :  { %2457 = vmatpush2.bf16.msra.mxu0 %v3646_v18  ;;  %v3727_v18 = vld [vmem:[#allocation11 + $0x388] ss:$16 sps:$4 sm:$0xff]  }
 0x170   :  { %2498 = vmatpush2.bf16.msra.mxu1 %v3649_v19  ;;  %2458 = vmatprep.subr.bf16.mxu0 %v3654_v20  ;;  %v3732_v19 = vld [vmem:[#allocation11 + $0x16c] ss:$16 sps:$4 sm:$0xff]  }
 0x171   :  { %2499 = vmatprep.subr.bf16.mxu1 %v3657_v21  ;;  %v3735_v20 = vld [vmem:[#allocation11 + $0x36c] ss:$16 sps:$4 sm:$0xff]   ;;  %v3730_v21 = vld [vmem:[#allocation11 + $0x168] ss:$16 sps:$4 sm:$0xff]  }
 0x173   :  { %2459 = vmatpush2.bf16.msra.mxu0 %v3652_v12  ;;  %v3733_v12 = vld [vmem:[#allocation11 + $0x368] ss:$16 sps:$4 sm:$0xff]  }
 0x174   :  { %2500 = vmatpush2.bf16.msra.mxu1 %v3655_v23  ;;  %2510 = vmatprep.subr.bf16.mxu0 %v3660_v24  ;;  %v3738_v23 = vld [vmem:[#allocation11 + $0x14c] ss:$16 sps:$4 sm:$0xff]  }
 0x175   :  { %2551 = vmatprep.subr.bf16.mxu1 %v3663_v25  ;;  %v3741_v24 = vld [vmem:[#allocation11 + $0x34c] ss:$16 sps:$4 sm:$0xff]   ;;  %v3736_v25 = vld [vmem:[#allocation11 + $0x148] ss:$16 sps:$4 sm:$0xff]  }
 0x176   :  { %2461 = vmatmul.mubr.bf16.vlgmr.msra.gmra.mxu0 %v4175_v27 }
 0x177   :  { %2502 = vmatmul.mubr.bf16.vlgmr.msra.gmra.mxu1 %v4179_v29  ;;  %2511 = vmatpush1.bf16.msra.mxu0 %v3658_v26  ;;  %v3739_v26 = vld [vmem:[#allocation11 + $0x348] ss:$16 sps:$4 sm:$0xff]  }
 0x178   :  { %2542 = vmatprep.mubr.bf16.mxu0 %v4141_v41  ;;  %2552 = vmatpush1.bf16.msra.mxu1 %v3661_v28  ;;  %v3679_v41 = vld [vmem:[#allocation11 + $0x288] ss:$16 sps:$4 sm:$0xff]   ;;  %v3744_v28 = vld [vmem:[#allocation11 + $0x12c] ss:$16 sps:$4 sm:$0xff]  }
 0x179   :  { %2583 = vmatprep.mubr.bf16.mxu1 %v4145_v44  ;;  %2512 = vmatprep.subr.bf16.mxu0 %v3666_v30  ;;  %v3682_v44 = vld [vmem:[#allocation11 + $0x68] ss:$16 sps:$4 sm:$0xff]   ;;  %v3747_v30 = vld [vmem:[#allocation11 + $0x32c] ss:$16 sps:$4 sm:$0xff]  }
 0x17a   :  { %2553 = vmatprep.subr.bf16.mxu1 %v3669_v31  ;;  %v3742_v31 = vld [vmem:[#allocation11 + $0x128] ss:$16 sps:$4 sm:$0xff]  }
 0x17b   :  { %2513 = vmatpush1.bf16.msra.mxu0 %v3664_v9  ;;  %v3745_v9 = vld [vmem:[#allocation11 + $0x328] ss:$16 sps:$4 sm:$0xff]  }
 0x17c   :  { %2554 = vmatpush1.bf16.msra.mxu1 %v3667_v32  ;;  %2514 = vmatprep.subr.bf16.mxu0 %v3672_v33  ;;  %v3750_v32 = vld [vmem:[#allocation11 + $0x10c] ss:$16 sps:$4 sm:$0xff]  }
 0x17d   :  { %2555 = vmatprep.subr.bf16.mxu1 %v3675_v10  ;;  %v3753_v33 = vld [vmem:[#allocation11 + $0x30c] ss:$16 sps:$4 sm:$0xff]   ;;  %v3748_v10 = vld [vmem:[#allocation11 + $0x108] ss:$16 sps:$4 sm:$0xff]  }
 0x17f   :  { %2515 = vmatpush1.bf16.msra.mxu0 %v3670_v34  ;;  %v3751_v34 = vld [vmem:[#allocation11 + $0x308] ss:$16 sps:$4 sm:$0xff]  }
 0x180   :  { %2556 = vmatpush1.bf16.msra.mxu1 %v3673_v35  ;;  %2516 = vmatprep.subr.bf16.mxu0 %v3678_v13  ;;  %v3756_v35 = vld [vmem:[#allocation11 + $0x4ec] ss:$16 sps:$4 sm:$0xff]  }
 0x181   :  { %2557 = vmatprep.subr.bf16.mxu1 %v3681_v36  ;;  %v3759_v13 = vld [vmem:[#allocation11 + $0x6ec] ss:$16 sps:$4 sm:$0xff]   ;;  %v3754_v36 = vld [vmem:[#allocation11 + $0x4e8] ss:$16 sps:$4 sm:$0xff]  }
 0x183   :  { %2517 = vmatpush1.bf16.msra.mxu0 %v3676_v37  ;;  %v3757_v37 = vld [vmem:[#allocation11 + $0x6e8] ss:$16 sps:$4 sm:$0xff]  }
 0x184   :  { %2558 = vmatpush1.bf16.msra.mxu1 %v3679_v41  ;;  %2518 = vmatprep.subr.bf16.mxu0 %v3684_v38  ;;  %v3762_v41 = vld [vmem:[#allocation11 + $0x4cc] ss:$16 sps:$4 sm:$0xff]  }
 0x185   :  { %2559 = vmatprep.subr.bf16.mxu1 %v3687_v39  ;;  %v3765_v38 = vld [vmem:[#allocation11 + $0x6cc] ss:$16 sps:$4 sm:$0xff]   ;;  %v3760_v39 = vld [vmem:[#allocation11 + $0x4c8] ss:$16 sps:$4 sm:$0xff]  }
 0x187   :  { %2519 = vmatpush1.bf16.msra.mxu0 %v3682_v44  ;;  %v3763_v44 = vld [vmem:[#allocation11 + $0x6c8] ss:$16 sps:$4 sm:$0xff]  }
 0x188   :  { %2560 = vmatpush1.bf16.msra.mxu1 %v3685_v40  ;;  %2520 = vmatprep.subr.bf16.mxu0 %v3690_v8  ;;  %v3768_v40 = vld [vmem:[#allocation11 + $0x4ac] ss:$16 sps:$4 sm:$0xff]  }
 0x189   :  { %2561 = vmatprep.subr.bf16.mxu1 %v3693_v42  ;;  %v3771_v8 = vld [vmem:[#allocation11 + $0x6ac] ss:$16 sps:$4 sm:$0xff]   ;;  %v3766_v42 = vld [vmem:[#allocation11 + $0x4a8] ss:$16 sps:$4 sm:$0xff]  }
 0x18b   :  { %2521 = vmatpush1.bf16.msra.mxu0 %v3688_v45  ;;  %v3774_v45 = vld [vmem:[#allocation11 + $0x48c] ss:$16 sps:$4 sm:$0xff]  }
 0x18c   :  { %2562 = vmatpush1.bf16.msra.mxu1 %v3691_v48  ;;  %2522 = vmatprep.subr.bf16.mxu0 %v3696_v49  ;;  %v3772_v48 = vld [vmem:[#allocation11 + $0x488] ss:$16 sps:$4 sm:$0xff]   ;;  %v3780_v49 = vld [vmem:[#allocation11 + $0x46c] ss:$16 sps:$4 sm:$0xff]  }
 0x18d   :  { %2563 = vmatprep.subr.bf16.mxu1 %v3699_v50  ;;  %v3783_v50 = vld [vmem:[#allocation11 + $0x66c] ss:$16 sps:$4 sm:$0xff]  }
 0x18f   :  { %2523 = vmatpush1.bf16.msra.mxu0 %v3694_v52  ;;  %v3781_v52 = vld [vmem:[#allocation11 + $0x668] ss:$16 sps:$4 sm:$0xff]  }
 0x190   :  { %2564 = vmatpush1.bf16.msra.mxu1 %v3697_v22  ;;  %2524 = vmatprep.subr.bf16.mxu0 %v3702_v53  ;;  %v3786_v22 = vld [vmem:[#allocation11 + $0x44c] ss:$16 sps:$4 sm:$0xff]  }
 0x191   :  { %2565 = vmatprep.subr.bf16.mxu1 %v3705_v54  ;;  %v3789_v53 = vld [vmem:[#allocation11 + $0x64c] ss:$16 sps:$4 sm:$0xff]   ;;  %v3784_v54 = vld [vmem:[#allocation11 + $0x448] ss:$16 sps:$4 sm:$0xff]  }
 0x193   :  { %2525 = vmatpush1.bf16.msra.mxu0 %v3700_v55  ;;  %v3787_v55 = vld [vmem:[#allocation11 + $0x648] ss:$16 sps:$4 sm:$0xff]  }
 0x194   :  { %2566 = vmatpush1.bf16.msra.mxu1 %v3703_v56  ;;  %2526 = vmatprep.subr.bf16.mxu0 %v3708_v57  ;;  %v3792_v56 = vld [vmem:[#allocation11 + $0x42c] ss:$16 sps:$4 sm:$0xff]  }
 0x195   :  { %2567 = vmatprep.subr.bf16.mxu1 %v3711_v58  ;;  %v3795_v57 = vld [vmem:[#allocation11 + $0x62c] ss:$16 sps:$4 sm:$0xff]   ;;  %v3790_v58 = vld [vmem:[#allocation11 + $0x428] ss:$16 sps:$4 sm:$0xff]  }
 0x197   :  { %2527 = vmatpush2.bf16.msra.mxu0 %v3706_v59  ;;  %v3793_v59 = vld [vmem:[#allocation11 + $0x628] ss:$16 sps:$4 sm:$0xff]  }
 0x198   :  { %2568 = vmatpush2.bf16.msra.mxu1 %v3709_v60  ;;  %2528 = vmatprep.subr.bf16.mxu0 %v3714_v61  ;;  %v3798_v60 = vld [vmem:[#allocation11 + $0x40c] ss:$16 sps:$4 sm:$0xff]  }
 0x199   :  { %2569 = vmatprep.subr.bf16.mxu1 %v3717_v62  ;;  %v3801_v61 = vld [vmem:[#allocation11 + $0x60c] ss:$16 sps:$4 sm:$0xff]   ;;  %v3796_v62 = vld [vmem:[#allocation11 + $0x408] ss:$16 sps:$4 sm:$0xff]  }
 0x19b   :  { %2529 = vmatpush2.bf16.msra.mxu0 %v3712_v63  ;;  %v3799_v63 = vld [vmem:[#allocation11 + $0x608] ss:$16 sps:$4 sm:$0xff]  }
 0x19c   :  { %2570 = vmatpush2.bf16.msra.mxu1 %v3715_v0  ;;  %2530 = vmatprep.subr.bf16.mxu0 %v3720_v1  ;;  %v3804_v0 = vld [vmem:[#allocation11 + $0x5ec] ss:$16 sps:$4 sm:$0xff]  }
 0x19d   :  { %2571 = vmatprep.subr.bf16.mxu1 %v3723_v2  ;;  %v3807_v1 = vld [vmem:[#allocation11 + $0x7ec] ss:$16 sps:$4 sm:$0xff]   ;;  %v3802_v2 = vld [vmem:[#allocation11 + $0x5e8] ss:$16 sps:$4 sm:$0xff]  }
 0x19f   :  { %2531 = vmatpush2.bf16.msra.mxu0 %v3718_v3  ;;  %v3805_v3 = vld [vmem:[#allocation11 + $0x7e8] ss:$16 sps:$4 sm:$0xff]  }
 0x1a0   :  { %2572 = vmatpush2.bf16.msra.mxu1 %v3721_v4  ;;  %2532 = vmatprep.subr.bf16.mxu0 %v3726_v5  ;;  %v3810_v4 = vld [vmem:[#allocation11 + $0x5cc] ss:$16 sps:$4 sm:$0xff]  }
 0x1a1   :  { %2573 = vmatprep.subr.bf16.mxu1 %v3729_v7  ;;  %v3813_v5 = vld [vmem:[#allocation11 + $0x7cc] ss:$16 sps:$4 sm:$0xff]   ;;  %v3808_v7 = vld [vmem:[#allocation11 + $0x5c8] ss:$16 sps:$4 sm:$0xff]  }
 0x1a3   :  { %2533 = vmatpush2.bf16.msra.mxu0 %v3724_v11  ;;  %v3811_v11 = vld [vmem:[#allocation11 + $0x7c8] ss:$16 sps:$4 sm:$0xff]  }
 0x1a4   :  { %2574 = vmatpush2.bf16.msra.mxu1 %v3727_v18  ;;  %2534 = vmatprep.subr.bf16.mxu0 %v3732_v19  ;;  %v3816_v18 = vld [vmem:[#allocation11 + $0x5ac] ss:$16 sps:$4 sm:$0xff]  }
 0x1a5   :  { %2575 = vmatprep.subr.bf16.mxu1 %v3735_v20  ;;  %v3819_v19 = vld [vmem:[#allocation11 + $0x7ac] ss:$16 sps:$4 sm:$0xff]   ;;  %v3814_v20 = vld [vmem:[#allocation11 + $0x5a8] ss:$16 sps:$4 sm:$0xff]  }
 0x1a7   :  { %2535 = vmatpush2.bf16.msra.mxu0 %v3730_v21  ;;  %v3817_v21 = vld [vmem:[#allocation11 + $0x7a8] ss:$16 sps:$4 sm:$0xff]  }
 0x1a8   :  { %2576 = vmatpush2.bf16.msra.mxu1 %v3733_v12  ;;  %2536 = vmatprep.subr.bf16.mxu0 %v3738_v23  ;;  %v3822_v12 = vld [vmem:[#allocation11 + $0x58c] ss:$16 sps:$4 sm:$0xff]  }
 0x1a9   :  { %2577 = vmatprep.subr.bf16.mxu1 %v3741_v24  ;;  %v3825_v23 = vld [vmem:[#allocation11 + $0x78c] ss:$16 sps:$4 sm:$0xff]   ;;  %v3820_v24 = vld [vmem:[#allocation11 + $0x588] ss:$16 sps:$4 sm:$0xff]  }
 0x1ab   :  { %2537 = vmatpush2.bf16.msra.mxu0 %v3736_v25  ;;  %v3823_v25 = vld [vmem:[#allocation11 + $0x788] ss:$16 sps:$4 sm:$0xff]  }
 0x1ac   :  { %2578 = vmatpush2.bf16.msra.mxu1 %v3739_v26  ;;  %2538 = vmatprep.subr.bf16.mxu0 %v3744_v28  ;;  %v3828_v26 = vld [vmem:[#allocation11 + $0x56c] ss:$16 sps:$4 sm:$0xff]  }
 0x1ad   :  { %2579 = vmatprep.subr.bf16.mxu1 %v3747_v30  ;;  %v3831_v28 = vld [vmem:[#allocation11 + $0x76c] ss:$16 sps:$4 sm:$0xff]   ;;  %v3826_v30 = vld [vmem:[#allocation11 + $0x568] ss:$16 sps:$4 sm:$0xff]  }
 0x1af   :  { %2539 = vmatpush2.bf16.msra.mxu0 %v3742_v31  ;;  %v3829_v31 = vld [vmem:[#allocation11 + $0x768] ss:$16 sps:$4 sm:$0xff]  }
 0x1b0   :  { %2580 = vmatpush2.bf16.msra.mxu1 %v3745_v9  ;;  %2540 = vmatprep.subr.bf16.mxu0 %v3750_v32  ;;  %v3834_v9 = vld [vmem:[#allocation11 + $0x54c] ss:$16 sps:$4 sm:$0xff]  }
 0x1b1   :  { %2581 = vmatprep.subr.bf16.mxu1 %v3753_v33  ;;  %v3837_v32 = vld [vmem:[#allocation11 + $0x74c] ss:$16 sps:$4 sm:$0xff]   ;;  %v3832_v33 = vld [vmem:[#allocation11 + $0x548] ss:$16 sps:$4 sm:$0xff]  }
 0x1b3   :  { %2541 = vmatpush2.bf16.msra.mxu0 %v3748_v10  ;;  %v3835_v10 = vld [vmem:[#allocation11 + $0x748] ss:$16 sps:$4 sm:$0xff]  }
 0x1b4   :  { %2582 = vmatpush2.bf16.msra.mxu1 %v3751_v34  ;;  %2592 = vmatprep.subr.bf16.mxu0 %v3756_v35  ;;  %v3840_v34 = vld [vmem:[#allocation11 + $0x52c] ss:$16 sps:$4 sm:$0xff]  }
 0x1b5   :  { %2633 = vmatprep.subr.bf16.mxu1 %v3759_v13  ;;  %v3843_v35 = vld [vmem:[#allocation11 + $0x72c] ss:$16 sps:$4 sm:$0xff]   ;;  %v3838_v13 = vld [vmem:[#allocation11 + $0x528] ss:$16 sps:$4 sm:$0xff]  }
 0x1b6   :  { %2543 = vmatmul.mubr.bf16.vlgmr.msra.gmra.mxu0 %v4143_v43  ;;  %v3769_v43 = vld [vmem:[#allocation11 + $0x6a8] ss:$16 sps:$4 sm:$0xff]  }
 0x1b7   :  { %2584 = vmatmul.mubr.bf16.vlgmr.msra.gmra.mxu1 %v4147_v47  ;;  %2593 = vmatpush1.bf16.msra.mxu0 %v3754_v36  ;;  %v3777_v47 = vld [vmem:[#allocation11 + $0x68c] ss:$16 sps:$4 sm:$0xff]   ;;  %v3841_v36 = vld [vmem:[#allocation11 + $0x728] ss:$16 sps:$4 sm:$0xff]  }
 0x1b8   :  { %2624 = vmatprep.mubr.bf16.mxu0 %v4167_v46  ;;  %2634 = vmatpush1.bf16.msra.mxu1 %v3757_v37  ;;  %v3775_v46 = vld [vmem:[#allocation11 + $0x688] ss:$16 sps:$4 sm:$0xff]   ;;  %v3846_v37 = vld [vmem:[#allocation11 + $0x50c] ss:$16 sps:$4 sm:$0xff]  }
 0x1b9   :  { %2665 = vmatprep.mubr.bf16.mxu1 %v4169_v51  ;;  %2594 = vmatprep.subr.bf16.mxu0 %v3762_v41  ;;  %v3778_v51 = vld [vmem:[#allocation11 + $0x468] ss:$16 sps:$4 sm:$0xff]   ;;  %v3849_v41 = vld [vmem:[#allocation11 + $0x70c] ss:$16 sps:$4 sm:$0xff]  }
 0x1ba   :  { %2635 = vmatprep.subr.bf16.mxu1 %v3765_v38  ;;  %v3844_v38 = vld [vmem:[#allocation11 + $0x508] ss:$16 sps:$4 sm:$0xff]  }
 0x1bb   :  { %2595 = vmatpush1.bf16.msra.mxu0 %v3760_v39  ;;  %v3847_v39 = vld [vmem:[#allocation11 + $0x708] ss:$16 sps:$4 sm:$0xff]  }
 0x1bc   :  { %2636 = vmatpush1.bf16.msra.mxu1 %v3763_v44  ;;  %2596 = vmatprep.subr.bf16.mxu0 %v3768_v40  ;;  %v3850_v44 = vld [vmem:[#allocation13 + $0x78] sm:$0xff]  }
 0x1bd   :  { %2637 = vmatprep.subr.bf16.mxu1 %v3771_v8  ;;  %v3851_v40 = vld [vmem:[#allocation13 + $0x38] sm:$0xff]   ;;  %v3852_v8 = vld [vmem:[#allocation13 + $0x70] sm:$0xff]  }
 0x1bf   :  { %2597 = vmatpush1.bf16.msra.mxu0 %v3766_v42 }
 0x1c0   :  { %2638 = vmatpush1.bf16.msra.mxu1 %v3769_v43  ;;  %2598 = vmatprep.subr.bf16.mxu0 %v3774_v45  ;;  %v3853_v45 = vld [vmem:[#allocation13 + $0x30] sm:$0xff]  }
 0x1c1   :  { %2639 = vmatprep.subr.bf16.mxu1 %v3777_v47 }
 0x1c3   :  { %2599 = vmatpush1.bf16.msra.mxu0 %v3772_v48  ;;  %v3854_v48 = vld [vmem:[#allocation13 + $0x68] sm:$0xff]  }
 0x1c4   :  { %2640 = vmatpush1.bf16.msra.mxu1 %v3775_v46  ;;  %2600 = vmatprep.subr.bf16.mxu0 %v3780_v49 }
 0x1c5   :  { %2641 = vmatprep.subr.bf16.mxu1 %v3783_v50 }
 0x1c7   :  { %2601 = vmatpush1.bf16.msra.mxu0 %v3778_v51  ;;  %v3855_v51 = vld [vmem:[#allocation13 + $0x28] sm:$0xff]  }
 0x1c8   :  { %2642 = vmatpush1.bf16.msra.mxu1 %v3781_v52  ;;  %2602 = vmatprep.subr.bf16.mxu0 %v3786_v22  ;;  %v3856_v22 = vld [vmem:[#allocation13 + $0x60] sm:$0xff]  }
 0x1c9   :  { %2643 = vmatprep.subr.bf16.mxu1 %v3789_v53 }
 0x1cb   :  { %2603 = vmatpush1.bf16.msra.mxu0 %v3784_v54  ;;  %v3866_v54 = vld [vmem:[#allocation13 + $0xf8] sm:$0xff]  }
 0x1cc   :  { %2644 = vmatpush1.bf16.msra.mxu1 %v3787_v55  ;;  %2604 = vmatprep.subr.bf16.mxu0 %v3792_v56  ;;  %v3868_v55 = vld [vmem:[#allocation13 + $0xf0] sm:$0xff]   ;;  %v3858_v56 = vld [vmem:[#allocation13 + $0x58] sm:$0xff]  }
 0x1cd   :  { %2645 = vmatprep.subr.bf16.mxu1 %v3795_v57  ;;  %v3869_v57 = vld [vmem:[#allocation13 + $0xb0] sm:$0xff]  }
 0x1cf   :  { %2605 = vmatpush1.bf16.msra.mxu0 %v3790_v58  ;;  %v3870_v58 = vld [vmem:[#allocation13 + $0xe8] sm:$0xff]  }
 0x1d0   :  { %2646 = vmatpush1.bf16.msra.mxu1 %v3793_v59  ;;  %2606 = vmatprep.subr.bf16.mxu0 %v3798_v60  ;;  %v3859_v59 = vld [vmem:[#allocation13 + $0x18] sm:$0xff]   ;;  %v3860_v60 = vld [vmem:[#allocation13 + $0x50] sm:$0xff]  }
 0x1d1   :  { %2647 = vmatprep.subr.bf16.mxu1 %v3801_v61  ;;  %v3871_v61 = vld [vmem:[#allocation13 + $0xa8] sm:$0xff]  }
 0x1d3   :  { %2607 = vmatpush1.bf16.msra.mxu0 %v3796_v62  ;;  %v3872_v62 = vld [vmem:[#allocation13 + $0xe0] sm:$0xff]  }
 0x1d4   :  { %2648 = vmatpush1.bf16.msra.mxu1 %v3799_v63  ;;  %2608 = vmatprep.subr.bf16.mxu0 %v3804_v0  ;;  %v3861_v63 = vld [vmem:[#allocation13 + $0x10] sm:$0xff]   ;;  %v3862_v0 = vld [vmem:[#allocation13 + $0x48] sm:$0xff]  }
 0x1d5   :  { %2649 = vmatprep.subr.bf16.mxu1 %v3807_v1  ;;  %v3873_v1 = vld [vmem:[#allocation13 + $0xa0] sm:$0xff]  }
 0x1d7   :  { %2609 = vmatpush2.bf16.msra.mxu0 %v3802_v2  ;;  %v3874_v2 = vld [vmem:[#allocation13 + $0xd8] sm:$0xff]  }
 0x1d8   :  { %2650 = vmatpush2.bf16.msra.mxu1 %v3805_v3  ;;  %2610 = vmatprep.subr.bf16.mxu0 %v3810_v4  ;;  %v3863_v3 = vld [vmem:[#allocation13 + $0x8] sm:$0xff]   ;;  %v3864_v4 = vld [vmem:[#allocation13 + $0x40] sm:$0xff]  }
 0x1d9   :  { %2651 = vmatprep.subr.bf16.mxu1 %v3813_v5  ;;  %v3875_v5 = vld [vmem:[#allocation13 + $0x98] sm:$0xff]  }
 0x1db   :  { %2611 = vmatpush2.bf16.msra.mxu0 %v3808_v7  ;;  %v3865_v7 = vld [vmem:[#allocation13] sm:$0xff]  }
 0x1dc   :  { %2652 = vmatpush2.bf16.msra.mxu1 %v3811_v11  ;;  %2612 = vmatprep.subr.bf16.mxu0 %v3816_v18  ;;  %v1044_v11 = vld [vmem:[%s4213_s5] sm:$0xf] }
 0x1dd   :  { %2653 = vmatprep.subr.bf16.mxu1 %v3819_v19  ;;  %v1049_v18 = vrot.slane %v1044_v11, %v709_v14  ;;  %v1053_v19 = vrot.slane %v1044_v11, %v713_v16 }
 0x1df   :  { %2613 = vmatpush2.bf16.msra.mxu0 %v3814_v20 }
 0x1e0   :  { %2654 = vmatpush2.bf16.msra.mxu1 %v3817_v21  ;;  %2614 = vmatprep.subr.bf16.mxu0 %v3822_v12 }
 0x1e1   :  { %2655 = vmatprep.subr.bf16.mxu1 %v3825_v23 }
 0x1e3   :  { %2615 = vmatpush2.bf16.msra.mxu0 %v3820_v24 }
 0x1e4   :  { %2656 = vmatpush2.bf16.msra.mxu1 %v3823_v25  ;;  %2616 = vmatprep.subr.bf16.mxu0 %v3828_v26 }
 0x1e5   :  { %2657 = vmatprep.subr.bf16.mxu1 %v3831_v28  ;;  %v3876_v28 = vld [vmem:[#allocation13 + $0xd0] sm:$0xff]  }
 0x1e7   :  { %2617 = vmatpush2.bf16.msra.mxu0 %v3826_v30  ;;  %v2678_v30 = vstv %s3118_s14 }
 0x1e8   :  { %2658 = vmatpush2.bf16.msra.mxu1 %v3829_v31  ;;  %2618 = vmatprep.subr.bf16.mxu0 %v3834_v9  ;;  %v3877_v9 = vld [vmem:[#allocation13 + $0x90] sm:$0xff]  }
 0x1e9   :  { %2659 = vmatprep.subr.bf16.mxu1 %v3837_v32 }
 0x1eb   :  { %2619 = vmatpush2.bf16.msra.mxu0 %v3832_v33 }
 0x1ec   :  { %2660 = vmatpush2.bf16.msra.mxu1 %v3835_v10  ;;  %2620 = vmatprep.subr.bf16.mxu0 %v3840_v34 }
 0x1ed   :  { %2661 = vmatprep.subr.bf16.mxu1 %v3843_v35 }
 0x1ef   :  { %2621 = vmatpush2.bf16.msra.mxu0 %v3838_v13  ;;  %v3878_v13 = vld [vmem:[#allocation13 + $0xc8] sm:$0xff]  }
 0x1f0   :  { %2662 = vmatpush2.bf16.msra.mxu1 %v3841_v36  ;;  %2622 = vmatprep.subr.bf16.mxu0 %v3846_v37  ;;  %v3879_v37 = vld [vmem:[#allocation13 + $0x88] sm:$0xff]  }
 0x1f1   :  { %2663 = vmatprep.subr.bf16.mxu1 %v3849_v41 }
 0x1f3   :  { %2623 = vmatpush2.bf16.msra.mxu0 %v3844_v38 }
 0x1f4   :  { %2664 = vmatpush2.bf16.msra.mxu1 %v3847_v39  ;;  %3408 = vmatprep.subr.bf16.mxu0 %v3850_v44  ;;  %v3880_v44 = vld [vmem:[#allocation13 + $0xc0] sm:$0xff]  }
 0x1f5   :  { %3430 = vmatprep.subr.bf16.mxu1 %v3866_v54 }
 0x1f6   :  { %2625 = vmatmul.mubr.bf16.vlgmr.msra.gmra.mxu0 %v4175_v27  ;;  %v2380_v42 = vpop.f32.mrf.mxu0  ;;  %v3867_v27 = vld [vmem:[#allocation13 + $0xb8] sm:$0xff]  }
 0x1f7   :  { %2666 = vmatmul.mubr.bf16.vlgmr.msra.gmra.mxu1 %v4179_v29  ;;  %v2421_v43 = vpop.f32.mrf.mxu1  ;;  %3409 = vmatpush3.bf16.msra.mxu0 %v3851_v40  ;;  %v3857_v29 = vld [vmem:[#allocation13 + $0x20] sm:$0xff]   ;;  %v2381_v20 = vadd.f32 %v2380_v42, %v1049_v18 }
 0x1f8   :  { %v2382_v47 = vpop.f32.mrf.mxu0  ;;  %3410 = vmatprep.subr.bf16.mxu0 %v3852_v8  ;;  %3431 = vmatpush3.bf16.msra.mxu1 %v3867_v27  ;;  %v3881_v40 = vld [vmem:[#allocation13 + $0x80] sm:$0xff]  }
 0x1f9   :  { %v2423_v46 = vpop.f32.mrf.mxu1  ;;  %3432 = vmatprep.subr.bf16.mxu1 %v3868_v55  ;;  %v2383_v21 = vadd.f32 %v2382_v47, %v1053_v19  ;;  %v2422_v12 = vadd.f32 %v2421_v43, %v2381_v20 }
 0x1fa   :  { %v2384_v49 = vpop.f32.mrf.mxu0 }
 0x1fb   :  { %v2425_v50 = vpop.f32.mrf.mxu1  ;;  %3411 = vmatpush3.bf16.msra.mxu0 %v3853_v45  ;;  %v2424_v24 = vadd.f32 %v2423_v46, %v2383_v21 }
 0x1fc   :  { %v2385_v52 = vpop.f32.mrf.mxu0  ;;  %3412 = vmatprep.subr.bf16.mxu0 %v3854_v48  ;;  %3433 = vmatpush3.bf16.msra.mxu1 %v3869_v57 }
 0x1fd   :  { %v2426_v53 = vpop.f32.mrf.mxu1  ;;  %3434 = vmatprep.subr.bf16.mxu1 %v3870_v58 }
 0x1fe   :  { %v1061_v53 = vrot.slane %v1044_v11, %v721_v17 }
 0x1ff   :  { %3413 = vmatpush3.bf16.msra.mxu0 %v3855_v51 }
 0x200   :  { %3414 = vmatprep.subr.bf16.mxu0 %v3856_v22  ;;  %3435 = vmatpush3.bf16.msra.mxu1 %v3871_v61  ;;  %v1057_v22 = vrot.slane %v1044_v11, %v717_v15 }
 0x201   :  { %3436 = vmatprep.subr.bf16.mxu1 %v3872_v62 }
 0x203   :  { %3415 = vmatpush3.bf16.msra.mxu0 %v3857_v29 }
 0x204   :  { %3416 = vmatprep.subr.bf16.mxu0 %v3858_v56  ;;  %3437 = vmatpush3.bf16.msra.mxu1 %v3873_v1 }
 0x205   :  { %3438 = vmatprep.subr.bf16.mxu1 %v3874_v2 }
 0x207   :  { %3417 = vmatpush3.bf16.msra.mxu0 %v3859_v59 }
 0x208   :  { %3418 = vmatprep.subr.bf16.mxu0 %v3860_v60  ;;  %3439 = vmatpush3.bf16.msra.mxu1 %v3875_v5 }
 0x209   :  { %3440 = vmatprep.subr.bf16.mxu1 %v3876_v28 }
 0x20b   :  { %3419 = vmatpush3.bf16.msra.mxu0 %v3861_v63 }
 0x20c   :  { %3420 = vmatprep.subr.bf16.mxu0 %v3862_v0  ;;  %3441 = vmatpush3.bf16.msra.mxu1 %v3877_v9 }
 0x20d   :  { %3442 = vmatprep.subr.bf16.mxu1 %v3878_v13 }
 0x20f   :  { %3421 = vmatpush3.bf16.msra.mxu0 %v3863_v3 }
 0x210   :  { %3422 = vmatprep.subr.bf16.mxu0 %v3864_v4  ;;  %3443 = vmatpush3.bf16.msra.mxu1 %v3879_v37 }
 0x211   :  { %3444 = vmatprep.subr.bf16.mxu1 %v3880_v44 }
 0x213   :  { %3423 = vmatpush3.bf16.msra.mxu0 %v3865_v7 }
 0x214   :  { %3445 = vmatpush3.bf16.msra.mxu1 %v3881_v40 }
 0x236   :  { %v2462_v23 = vpop.f32.mrf.mxu0 }
 0x237   :  { %v2463_v25 = vadd.f32 %v2462_v23, %v2422_v12  ;;  %v2503_v26 = vpop.f32.mrf.mxu1  ;;  %v3375_v12 = vld [vmem:[%s4215_s7] ss:$0 sm:$0xff] }
 0x238   :  { %v2464_v31 = vpop.f32.mrf.mxu0 }
 0x239   :  { %v2504_v32 = vadd.f32 %v2503_v26, %v2463_v25  ;;  %v2465_v33 = vadd.f32 %v2464_v31, %v2424_v24  ;;  %v2505_v10 = vpop.f32.mrf.mxu1 }
 0x23a   :  { %v2466_v14 = vpop.f32.mrf.mxu0 }
 0x23b   :  { %vm2674_vm8 = vcmp.ge.f32.partialorder %v2504_v32, 0.0  ;;  %v2679_v16 = vmul.f32 %v2678_v30, %v2504_v32  ;;  %v2506_v34 = vadd.f32 %v2505_v10, %v2465_v33  ;;  %v2507_v35 = vpop.f32.mrf.mxu1 }
 0x23c   :  { %v2467_v36 = vpop.f32.mrf.mxu0 }
 0x23d   :  { %vm2675_vm9 = vcmp.ge.f32.partialorder %v2506_v34, 0.0  ;;  %v2680_v41 = vmul.f32 %v2678_v30, %v2506_v34  ;;  %v2508_v38 = vpop.f32.mrf.mxu1  ;;  %v2683_v39 = vsel %vm2674_vm8, %v2504_v32, %v2679_v16 }
 0x23e   :  { %v2687_v43 = vpack.c.bf16 %v2683_v39, %v2683_v39 }
 0x23f   :  { %v2684_v8 = vsel %vm2675_vm9, %v2506_v34, %v2680_v41 }
 0x240   :  { %v2688_v42 = vpack.c.bf16 %v2684_v8, %v2684_v8 }
 0x242   :  { %2986 = vmatprep.mubr.bf16.mxu0 %v2688_v42 }
 0x243   :  { %2987 = vmatmul.mubr.bf16.vlgmr.msra.gmra.mxu0 %v2687_v43 }
 0x276   :  { %v2544_v45 = vpop.f32.mrf.mxu0 }
 0x277   :  { %v2585_v47 = vpop.f32.mrf.mxu1  ;;  %v2545_v54 = vadd.f32 %v2544_v45, %v1057_v22 }
 0x278   :  { %v2546_v48 = vpop.f32.mrf.mxu0 }
 0x279   :  { %v2587_v46 = vpop.f32.mrf.mxu1  ;;  %v2547_v27 = vadd.f32 %v2546_v48, %v1061_v53  ;;  %v2586_v55 = vadd.f32 %v2585_v47, %v2545_v54 }
 0x27a   :  { %v2548_v49 = vpop.f32.mrf.mxu0 }
 0x27b   :  { %v2589_v50 = vpop.f32.mrf.mxu1  ;;  %v2588_v56 = vadd.f32 %v2587_v46, %v2547_v27 }
 0x27c   :  { %v2549_v51 = vpop.f32.mrf.mxu0 }
 0x27d   :  { %v2590_v52 = vpop.f32.mrf.mxu1 }
 0x2b6   :  { %v2626_v29 = vpop.f32.mrf.mxu0 }
 0x2b7   :  { %v2627_v57 = vadd.f32 %v2626_v29, %v2586_v55  ;;  %v2667_v58 = vpop.f32.mrf.mxu1 }
 0x2b8   :  { %v2628_v59 = vpop.f32.mrf.mxu0 }
 0x2b9   :  { %v2668_v60 = vadd.f32 %v2667_v58, %v2627_v57  ;;  %v2629_v61 = vadd.f32 %v2628_v59, %v2588_v56  ;;  %v2669_v62 = vpop.f32.mrf.mxu1 }
 0x2ba   :  { %v2630_v63 = vpop.f32.mrf.mxu0 }
 0x2bb   :  { %vm2676_vm10 = vcmp.ge.f32.partialorder %v2668_v60, 0.0  ;;  %v2681_v0 = vmul.f32 %v2678_v30, %v2668_v60  ;;  %v2670_v1 = vadd.f32 %v2669_v62, %v2629_v61  ;;  %v2671_v2 = vpop.f32.mrf.mxu1 }
 0x2bc   :  { %v2631_v15 = vpop.f32.mrf.mxu0 }
 0x2bd   :  { %vm2677_vm11 = vcmp.ge.f32.partialorder %v2670_v1, 0.0  ;;  %v2682_v6 = vmul.f32 %v2678_v30, %v2670_v1  ;;  %v2672_v17 = vpop.f32.mrf.mxu1  ;;  %v2685_v3 = vsel %vm2676_vm10, %v2668_v60, %v2681_v0 }
 0x2be   :  { %v2689_v7 = vpack.c.bf16 %v2685_v3, %v2685_v3 }
 0x2bf   :  { %v2686_v4 = vsel %vm2677_vm11, %v2670_v1, %v2682_v6 }
 0x2c0   :  { %v2690_v5 = vpack.c.bf16 %v2686_v4, %v2686_v4 }
 0x2c2   :  { %3026 = vmatprep.mubr.bf16.mxu1 %v2690_v5 }
 0x2c3   :  { %3027 = vmatmul.mubr.bf16.vlgmr.msra.gmra.mxu1 %v2689_v7 }
 0x303   :  { %v3424_v11 = vpop.f32.mrf.mxu0 }
 0x305   :  { %v3425_v18 = vpop.f32.mrf.mxu0 }
 0x306   :  { %v3426_v19 = vadd.f32 %v3425_v18, %v3424_v11 }
 0x307   :  { %v3427_v20 = vpop.f32.mrf.mxu0 }
 0x308   :  { %v2989_v25 = vadd.f32 %v3426_v19, %v3375_v12 }
 0x309   :  { %v3428_v21 = vpop.f32.mrf.mxu0 }
 0x383   :  { %v3446_v23 = vpop.f32.mrf.mxu1 }
 0x385   :  { %v3447_v24 = vpop.f32.mrf.mxu1 }
 0x386   :  { %v3448_v26 = vadd.f32 %v3447_v24, %v3446_v23 }
 0x387   :  { %v3449_v28 = vpop.f32.mrf.mxu1 }
 0x388   :  { %v3029_v30 = vadd.f32 %v3448_v26, %v2989_v25 }
 0x389   :  { %v3450_v31 = vpop.f32.mrf.mxu1 }
 0x38a   :  { %v3034_v9 = vpack.c.bf16 %v3029_v30, %v3029_v30 }
 0x38c   :  { %3035 = vst [vmem:[#allocation14] sm:$0xf] %v3034_v9 }
 0x38d   :  { %4001 = shalt.err (!%p3998_p1)
}
 0x38e   :  { %3045 = dma.vmem_to_hbm [thread:$0]  %s3043_s17, 64, %s4216_s8, [#allocation5]  }
 0x38f   :  { %4018 = dma.done.wait [#allocation5], 64  }
 0x390   :  { %4019 = vsyncadd [#allocation5], 4294967232 }
 0x391   :  { %3049 = vsyncpa [#allocation4], 1 }
 0x392   :  { %3050 = vsyncpa [#allocation9], 1 }
 0x393   :  { %3051 = vsyncpa [#allocation12], 1 }
 0x394   :  { %3052 = vsyncpa [#allocation5], 1 }
 0x395   :  { %3053 = vsyncpa [#allocation6], 1 }

</bundles_post_ra>
